<compile_context>
chip_gen: v6e
topology: v6e:2x2x1
jax: 0.10.0
libtpu: 0.0.40
codegen_flags: <defaults>
</compile_context>

<pallas_src>
import functools

import jax
import jax.numpy as jnp
from jax.experimental import pallas as pl
from jax.experimental.pallas import tpu as pltpu


def _round_up(x, m):
    return ((x + m - 1) // m) * m


def _num_tensorcores():
    """Best-effort TensorCores per JAX device (2 on v7x, else assume 1)."""
    try:
        kind = str(getattr(jax.devices()[0], "device_kind", "")).lower()
    except Exception:
        return 1
    if "v7" in kind or "tpu7" in kind:
        return 2
    return 1


def _choose_tile(batch, ncores, cap=512):
    """Batch tile (multiple of 8, <= cap) and a step count divisible by ncores."""
    per_core = -(-batch // ncores)                 # ceil
    tb = min(_round_up(max(per_core, 8), 8), cap)
    steps = -(-batch // tb)
    steps = _round_up(steps, ncores)               # even work across TCs
    return tb, steps


def policy_kernel(x_ref, w1_ref, b1_ref, w2_ref, b2_ref, o_ref):
    """One batch tile of softmax(relu(x @ W1 + b1) @ W2 + b2, axis=-1).

    x / W1 / W2 are bf16 MXU operands; accumulation and all elementwise math
    (bias add, ReLU, exp, softmax) stay in f32.  Padded logit lanes carry a
    -1e30 bias so exp() underflows to 0 and they do not perturb the softmax.
    The result is stored lane-dense in bf16.
    """
    # Layer 1: Linear (bf16 MXU, f32 accumulate) + bias + ReLU in f32.
    h = jnp.dot(x_ref[...], w1_ref[...], preferred_element_type=jnp.float32)
    h = jnp.maximum(h + b1_ref[...], 0.0)               # (tb, Hp) + (1, Hp)

    # Layer 2: Linear (bf16 MXU, f32 accumulate) + bias in f32.
    logits = jnp.dot(h.astype(w2_ref.dtype), w2_ref[...],
                     preferred_element_type=jnp.float32)
    logits = logits + b2_ref[...]                        # (tb, Ap) + (1, Ap)

    # Numerically stable softmax over the lane-dense (128-wide) last axis.
    m = jnp.max(logits, axis=-1, keepdims=True)
    e = jnp.exp(logits - m)
    denom = jnp.sum(e, axis=-1, keepdims=True)
    o_ref[...] = (e * pl.reciprocal(denom, approx=True)).astype(o_ref.dtype)


def prepare_params(w1_t, b1, w2_t, b2):
    """One-time preprocessing: pad feature axes to 128 lanes, cast MXU operands
    to bf16, keep biases in f32 (padded action lanes get a -1e30 bias).

    Weights are expected pre-transposed as (in_features, out_features)
    (i.e. PyTorch nn.Linear.weight.T); biases as (1, out_features).
    """
    D, H = w1_t.shape
    _, A = w2_t.shape
    Hp = _round_up(H, 128)
    Ap = _round_up(A, 128)
    w1p = jnp.zeros((D, Hp), jnp.bfloat16).at[:, :H].set(w1_t.astype(jnp.bfloat16))
    b1p = jnp.zeros((1, Hp), jnp.float32).at[:, :H].set(b1.astype(jnp.float32))
    w2p = jnp.zeros((Hp, Ap), jnp.bfloat16).at[:H, :A].set(w2_t.astype(jnp.bfloat16))
    b2p = jnp.full((1, Ap), -1e30, jnp.float32).at[:, :A].set(b2.astype(jnp.float32))
    w1p, b1p, w2p, b2p = jax.device_put((w1p, b1p, w2p, b2p))
    return w1p, b1p, w2p, b2p


@functools.partial(jax.jit, static_argnames=("tb", "steps", "action_dim"))
def _forward_impl(x, w1p, b1p, w2p, b2p, *, tb, steps, action_dim):
    B, D = x.shape
    Hp = w1p.shape[1]
    Ap = w2p.shape[1]
    Bp = tb * steps

    # Per-call activation prep only (weights are already padded/cast).
    xp = jnp.zeros((Bp, D), jnp.bfloat16).at[:B].set(x.astype(jnp.bfloat16))

    cost = pl.CostEstimate(
        flops=2 * Bp * (D * Hp + Hp * Ap),
        transcendentals=Bp * Ap,
        bytes_accessed=(xp.size * 2 + w1p.size * 2 + w2p.size * 2
                        + b1p.size * 4 + b2p.size * 4 + Bp * Ap * 2),
    )

    out = pl.pallas_call(
        policy_kernel,
        out_shape=jax.ShapeDtypeStruct((Bp, Ap), jnp.bfloat16),
        grid=(steps,),
        in_specs=[
            # x tile: (tb, D), marches down the batch axis.
            pl.BlockSpec((tb, D), lambda i: (i, 0)),
            # Weights / biases: full (tiny) arrays, same block every step.
            # TODO(synk): if D/Hp ever scale to multi-MiB weights, add
            # pipeline_mode=pl.Buffered(1) to these constant-index specs and
            # set an explicit vmem_limit_bytes (v7x has only 64 MiB VMEM), or
            # tile the K axis.
            pl.BlockSpec((D, Hp), lambda i: (0, 0)),
            pl.BlockSpec((1, Hp), lambda i: (0, 0)),
            pl.BlockSpec((Hp, Ap), lambda i: (0, 0)),
            pl.BlockSpec((1, Ap), lambda i: (0, 0)),
        ],
        out_specs=pl.BlockSpec((tb, Ap), lambda i: (i, 0)),
        compiler_params=pltpu.CompilerParams(
            dimension_semantics=("parallel",),
        ),
        cost_estimate=cost,
    )(xp, w1p, b1p, w2p, b2p)

    # Strip batch / lane padding; cast the tiny real slice back to input dtype.
    return out[:B, :action_dim].astype(x.dtype)


def policy_network_forward(x, w1p, b1p, w2p, b2p, action_dim, *, max_tile=512):
    """x: (B, input_dim) f32; params from prepare_params().
    Returns softmax probabilities (B, action_dim) in x.dtype."""
    B = x.shape[0]
    tb, steps = _choose_tile(B, _num_tensorcores(), cap=max_tile)
    return _forward_impl(x, w1p, b1p, w2p, b2p,
                         tb=tb, steps=steps, action_dim=action_dim)


def init_params(key, input_dim, hidden_dim, action_dim):
    """Deterministic PyTorch-style (uniform +/- 1/sqrt(fan_in)) init.
    Weights are stored already transposed: (in_features, out_features)."""
    k1, k2, k3, k4 = jax.random.split(key, 4)
    bound1 = 1.0 / jnp.sqrt(jnp.float32(input_dim))
    bound2 = 1.0 / jnp.sqrt(jnp.float32(hidden_dim))
    w1_t = jax.random.uniform(k1, (input_dim, hidden_dim), jnp.float32,
                              minval=-bound1, maxval=bound1)
    b1 = jax.random.uniform(k2, (1, hidden_dim), jnp.float32,
                            minval=-bound1, maxval=bound1)
    w2_t = jax.random.uniform(k3, (hidden_dim, action_dim), jnp.float32,
                              minval=-bound2, maxval=bound2)
    b2 = jax.random.uniform(k4, (1, action_dim), jnp.float32,
                            minval=-bound2, maxval=bound2)
    return w1_t, b1, w2_t, b2


def reference_forward_f32(x, w1_t, b1, w2_t, b2):
    h = jnp.maximum(x @ w1_t + b1, 0.0)
    logits = h @ w2_t + b2
    return jax.nn.softmax(logits, axis=-1)


def reference_forward_bf16(x, w1_t, b1, w2_t, b2):
    """Mirrors the kernel's bf16-operand / f32-accumulate matmuls."""
    h = jnp.dot(x.astype(jnp.bfloat16), w1_t.astype(jnp.bfloat16),
                preferred_element_type=jnp.float32)
    h = jnp.maximum(h + b1, 0.0)
    logits = jnp.dot(h.astype(jnp.bfloat16), w2_t.astype(jnp.bfloat16),
                     preferred_element_type=jnp.float32)
    logits = logits + b2
    return jax.nn.softmax(logits, axis=-1)


if __name__ == "__main__":
    batch = 512        # 1 tile of 512 on v5e/v6e; 2 tiles of 256 on dual-TC v7x
    input_dim = 16     # state dimension
    hidden_dim = 32    # module's global `hidden_dim`
    action_dim = 8

    key = jax.random.PRNGKey(0)
    kx, kp = jax.random.split(key)
    x = jax.random.normal(kx, (batch, input_dim), dtype=jnp.float32)
    w1_t, b1, w2_t, b2 = init_params(kp, input_dim, hidden_dim, action_dim)

    # One-time preprocessing (hoisted out of the per-call hot path).
    w1p, b1p, w2p, b2p = prepare_params(w1_t, b1, w2_t, b2)

    probs = policy_network_forward(x, w1p, b1p, w2p, b2p, action_dim)
    probs = jax.block_until_ready(probs)

    # Sanity checks: against a reference mirroring the kernel's bf16 matmul
    # operands (tight, modulo bf16 output rounding), against the pure-f32
    # reference (loose), and probability normalization (approx reciprocal +
    # bf16 storage -> ~1e-2 tolerance on the row sums).
    ref_bf16 = reference_forward_bf16(x, w1_t, b1, w2_t, b2)
    ref_f32 = reference_forward_f32(x, w1_t, b1, w2_t, b2)

    assert probs.shape == (batch, action_dim)
    assert probs.dtype == x.dtype
    assert bool(jnp.all(jnp.isfinite(probs)))
    assert jnp.allclose(probs, ref_bf16, atol=5e-3, rtol=5e-3)
    assert jnp.allclose(probs, ref_f32, atol=2e-2, rtol=2e-2)
    assert jnp.allclose(jnp.sum(probs, axis=-1), 1.0, atol=2e-2)

    print("KERNEL_OK")
</pallas_src>

<mosaic_0001>
module attributes {stable_mosaic.version = 11 : i64} {
  func.func @policy_kernel(%arg0: i32, %arg1: memref<512x16xbf16, #tpu.memory_space<vmem>>, %arg2: memref<16x128xbf16, #tpu.memory_space<vmem>>, %arg3: memref<1x128xf32, #tpu.memory_space<vmem>>, %arg4: memref<128x128xbf16, #tpu.memory_space<vmem>>, %arg5: memref<1x128xf32, #tpu.memory_space<vmem>>, %arg6: memref<512x128xbf16, #tpu.memory_space<vmem>>) attributes {dimension_semantics = [#tpu.dimension_semantics<parallel>], iteration_bounds = array<i64: 1>, scalar_prefetch = 0 : i64, scratch_operands = 0 : i64, tpu.core_type = #tpu.core_type<tc>, window_params = [{transform_indices = @transform_0, window_bounds = array<i64: 512, 16>}, {pipeline_mode = #tpu.pipeline_mode<synchronous>, transform_indices = @transform_1, window_bounds = array<i64: 16, 128>}, {pipeline_mode = #tpu.pipeline_mode<synchronous>, transform_indices = @transform_2, window_bounds = array<i64: 1, 128>}, {pipeline_mode = #tpu.pipeline_mode<synchronous>, transform_indices = @transform_3, window_bounds = array<i64: 128, 128>}, {pipeline_mode = #tpu.pipeline_mode<synchronous>, transform_indices = @transform_4, window_bounds = array<i64: 1, 128>}, {transform_indices = @transform_5, window_bounds = array<i64: 512, 128>}]} {
    %c0 = arith.constant 0 : index
    %c0_0 = arith.constant 0 : index
    %0 = vector.load %arg1[%c0, %c0_0] : memref<512x16xbf16, #tpu.memory_space<vmem>>, vector<512x16xbf16>
    %c0_1 = arith.constant 0 : index
    %c0_2 = arith.constant 0 : index
    %1 = vector.load %arg2[%c0_1, %c0_2] : memref<16x128xbf16, #tpu.memory_space<vmem>>, vector<16x128xbf16>
    %cst = arith.constant dense<0.000000e+00> : vector<512x128xf32>
    %2 = tpu.matmul %0, %1, %cst {dimension_numbers = #tpu.dot_dimension_numbers<[1], [0], [0], [1], [0, 0, 1, 1], [], []>} : vector<512x16xbf16>, vector<16x128xbf16>, vector<512x128xf32> -> vector<512x128xf32>
    %c0_3 = arith.constant 0 : index
    %c0_4 = arith.constant 0 : index
    %3 = vector.load %arg3[%c0_3, %c0_4] : memref<1x128xf32, #tpu.memory_space<vmem>>, vector<1x128xf32>
    %4 = vector.broadcast %3 : vector<1x128xf32> to vector<512x128xf32>
    %5 = arith.addf %2, %4 : vector<512x128xf32>
    %cst_5 = arith.constant 0.000000e+00 : f32
    %6 = vector.broadcast %cst_5 : f32 to vector<512x128xf32>
    %7 = arith.maximumf %5, %6 : vector<512x128xf32>
    %8 = arith.truncf %7 : vector<512x128xf32> to vector<512x128xbf16>
    %c0_6 = arith.constant 0 : index
    %c0_7 = arith.constant 0 : index
    %9 = vector.load %arg4[%c0_6, %c0_7] : memref<128x128xbf16, #tpu.memory_space<vmem>>, vector<128x128xbf16>
    %cst_8 = arith.constant dense<0.000000e+00> : vector<512x128xf32>
    %10 = tpu.matmul %8, %9, %cst_8 {dimension_numbers = #tpu.dot_dimension_numbers<[1], [0], [0], [1], [0, 0, 1, 1], [], []>} : vector<512x128xbf16>, vector<128x128xbf16>, vector<512x128xf32> -> vector<512x128xf32>
    %c0_9 = arith.constant 0 : index
    %c0_10 = arith.constant 0 : index
    %11 = vector.load %arg5[%c0_9, %c0_10] : memref<1x128xf32, #tpu.memory_space<vmem>>, vector<1x128xf32>
    %12 = vector.broadcast %11 : vector<1x128xf32> to vector<512x128xf32>
    %13 = arith.addf %10, %12 : vector<512x128xf32>
    %cst_11 = arith.constant dense<0xFF800000> : vector<512xf32>
    %14 = vector.multi_reduction <maximumf>, %13, %cst_11 [1] : vector<512x128xf32> to vector<512xf32>
    %15 = vector.shape_cast %14 : vector<512xf32> to vector<512x1xf32>
    %16 = vector.broadcast %15 : vector<512x1xf32> to vector<512x128xf32>
    %17 = arith.subf %13, %16 : vector<512x128xf32>
    %18 = math.exp %17 : vector<512x128xf32>
    %cst_12 = arith.constant dense<0.000000e+00> : vector<512xf32>
    %19 = vector.multi_reduction <add>, %18, %cst_12 [1] : vector<512x128xf32> to vector<512xf32>
    %20 = vector.shape_cast %19 : vector<512xf32> to vector<512x1xf32>
    %21 = tpu.reciprocal %20 {approx = true} : vector<512x1xf32> -> vector<512x1xf32>
    %22 = vector.broadcast %21 : vector<512x1xf32> to vector<512x128xf32>
    %23 = arith.mulf %18, %22 : vector<512x128xf32>
    %24 = arith.truncf %23 : vector<512x128xf32> to vector<512x128xbf16>
    %c0_13 = arith.constant 0 : index
    %c0_14 = arith.constant 0 : index
    %25 = vector.load %arg6[%c0_13, %c0_14] : memref<512x128xbf16, #tpu.memory_space<vmem>>, vector<512x128xbf16>
    tpu.vector_store %arg6[%c0_13, %c0_14], %24 {strides = array<i32>} : memref<512x128xbf16, #tpu.memory_space<vmem>>, vector<512x128xbf16>,
    return
  }
  func.func @transform_0(%arg0: i32) -> (i32, i32) {
    %c0_i32 = arith.constant 0 : i32
    %c0_i32_0 = arith.constant 0 : i32
    return %arg0, %c0_i32 : i32, i32
  }
  func.func @transform_1(%arg0: i32) -> (i32, i32) {
    %c0_i32 = arith.constant 0 : i32
    %c0_i32_0 = arith.constant 0 : i32
    %c0_i32_1 = arith.constant 0 : i32
    return %c0_i32, %c0_i32_0 : i32, i32
  }
  func.func @transform_2(%arg0: i32) -> (i32, i32) {
    %c0_i32 = arith.constant 0 : i32
    %c0_i32_0 = arith.constant 0 : i32
    %c0_i32_1 = arith.constant 0 : i32
    return %c0_i32, %c0_i32_0 : i32, i32
  }
  func.func @transform_3(%arg0: i32) -> (i32, i32) {
    %c0_i32 = arith.constant 0 : i32
    %c0_i32_0 = arith.constant 0 : i32
    %c0_i32_1 = arith.constant 0 : i32
    return %c0_i32, %c0_i32_0 : i32, i32
  }
  func.func @transform_4(%arg0: i32) -> (i32, i32) {
    %c0_i32 = arith.constant 0 : i32
    %c0_i32_0 = arith.constant 0 : i32
    %c0_i32_1 = arith.constant 0 : i32
    return %c0_i32, %c0_i32_0 : i32, i32
  }
  func.func @transform_5(%arg0: i32) -> (i32, i32) {
    %c0_i32 = arith.constant 0 : i32
    %c0_i32_0 = arith.constant 0 : i32
    return %arg0, %c0_i32 : i32, i32
  }
}

</mosaic_0001>

<bundles_post_ra>
// kernel: _forward_impl.1
= control target key start
LH: loop header
LB: loop body
LE: loop exit
PB: predicated region body
PF: predicated region fallthrough
CT: control target
= control target key end

     0   :  { %vm260_vm0 = vcmask 130048   ;;  %s3859_s1 = inlined_call_operand.vmem [shape: bf16[16,128], index: 1, kind: input, shape index: {}]   ;;  %s3860_s0 = inlined_call_operand.vmem [shape: bf16[512,16], index: 0, kind: input, shape index: {}]   ;;  %s3861_s3 = inlined_call_operand.vmem [shape: bf16[128,128], index: 3, kind: input, shape index: {}]   ;;  %s3862_s2 = inlined_call_operand.vmem [shape: f32[1,128], index: 2, kind: input, shape index: {}]   ;;  %s3863_s4 = inlined_call_operand.vmem [shape: f32[1,128], index: 4, kind: input, shape index: {}]   ;;  %s3864_s5 = inlined_call_operand.vmem [shape: bf16[512,128], index: 5, kind: output, shape index: {}]  }
   0x1   :  { %v2631_v0 = vld [vmem:[%s3859_s1] sm:$0xff]   ;;  %v2633_v2 = vld [vmem:[%s3860_s0 + $0x8] sm:$0xff]   ;;  %v2634_v3 = vld [vmem:[%s3860_s0 + $0x10] sm:$0xff]  }
   0x2   :  { %v2632_v1 = vld [vmem:[%s3860_s0] sm:$0xff]   ;;  %2469 = vmatprep.subr.bf16.mxu0 %v2631_v0  ;;  %v2635_v4 = vld [vmem:[%s3860_s0 + $0x18] sm:$0xff]   ;;  %v2637_v6 = vld [vmem:[%s3860_s0 + $0x28] sm:$0xff]  }
   0x3   :  { %2470 = vmatpush3.bf16.msra.mxu0 %v2631_v0  ;;  %2471 = vmatprep.mubr.msk.bf16.mxu0 %vm260_vm0, %v2632_v1  ;;  %v2636_v5 = vld [vmem:[%s3860_s0 + $0x20] sm:$0xff]   ;;  %v2638_v7 = vld [vmem:[%s3860_s0 + $0x30] sm:$0xff]   ;;  %v2653_v8 = vld [vmem:[%s3861_s3 + $0x38] sm:$0xff]  }
   0x4   :  { %2535 = vmatprep.subr.bf16.mxu0 %v2653_v8  ;;  %2615 = vmatprep.subr.bf16.mxu1 %v2653_v8  ;;  %v2639_v9 = vld [vmem:[%s3860_s0 + $0x38] sm:$0xff]   ;;  %v2640_v10 = vld [vmem:[%s3860_s0 + $0x40] sm:$0xff]   ;;  %v2658_v11 = vld [vmem:[%s3861_s3 + $0x30] sm:$0xff]  }
   0x5   :  { %2623 = vmatpush3.bf16.msra.mxu1 %v2653_v8  ;;  %v2663_v12 = vld [vmem:[%s3861_s3 + $0x28] sm:$0xff]   ;;  %v2642_v14 = vld [vmem:[%s3860_s0 + $0x50] sm:$0xff]   ;;  %v2667_v15 = vld [vmem:[%s3861_s3 + $0x20] sm:$0xff]  }
   0x6   :  { %2472 = vmatmul.mubr.msk.bf16.vlgmr.msra.gmra.mxu0 %vm260_vm0, %v2633_v2  ;;  %2616 = vmatprep.subr.bf16.mxu1 %v2658_v11  ;;  %v2641_v13 = vld [vmem:[%s3860_s0 + $0x48] sm:$0xff]   ;;  %v2668_v16 = vld [vmem:[%s3861_s3 + $0x18] sm:$0xff]   ;;  %v2669_v17 = vld [vmem:[%s3861_s3 + $0x10] sm:$0xff]  }
   0x7   :  { %2475 = vmatprep.mubr.msk.bf16.mxu0 %vm260_vm0, %v2634_v3  ;;  %2536 = vmatpush3.bf16.msra.mxu0 %v2653_v8  ;;  %v2643_v18 = vld [vmem:[%s3860_s0 + $0x58] sm:$0xff]   ;;  %v2644_v19 = vld [vmem:[%s3860_s0 + $0x60] sm:$0xff]   ;;  %v2670_v20 = vld [vmem:[%s3861_s3 + $0x8] sm:$0xff]  }
   0x8   :  { %2537 = vmatprep.subr.bf16.mxu0 %v2658_v11  ;;  %v2671_v21 = vld [vmem:[%s3861_s3] sm:$0xff]   ;;  %v2645_v22 = vld [vmem:[%s3860_s0 + $0x68] sm:$0xff]   ;;  %v2646_v23 = vld [vmem:[%s3860_s0 + $0x70] sm:$0xff]  }
   0x9   :  { %2624 = vmatpush3.bf16.msra.mxu1 %v2658_v11  ;;  %v2647_v24 = vld [vmem:[%s3860_s0 + $0x78] sm:$0xff]   ;;  %v2648_v25 = vld [vmem:[%s3860_s0 + $0x80] sm:$0xff]   ;;  %v2649_v26 = vld [vmem:[%s3860_s0 + $0x88] sm:$0xff]  }
   0xa   :  { %2617 = vmatprep.subr.bf16.mxu1 %v2663_v12  ;;  %v2650_v27 = vld [vmem:[%s3860_s0 + $0x90] sm:$0xff]   ;;  %v2651_v28 = vld [vmem:[%s3860_s0 + $0x98] sm:$0xff]   ;;  %v2652_v29 = vld [vmem:[%s3860_s0 + $0xa0] sm:$0xff]  }
   0xb   :  { %2538 = vmatpush3.bf16.msra.mxu0 %v2658_v11  ;;  %v2654_v30 = vld [vmem:[%s3860_s0 + $0xa8] sm:$0xff]   ;;  %v2655_v31 = vld [vmem:[%s3860_s0 + $0xb0] sm:$0xff]   ;;  %v2656_v32 = vld [vmem:[%s3860_s0 + $0xb8] sm:$0xff]  }
   0xc   :  { %2539 = vmatprep.subr.bf16.mxu0 %v2663_v12  ;;  %v2657_v33 = vld [vmem:[%s3860_s0 + $0xc0] sm:$0xff]   ;;  %v2659_v34 = vld [vmem:[%s3860_s0 + $0xc8] sm:$0xff]   ;;  %v2660_v35 = vld [vmem:[%s3860_s0 + $0xd0] sm:$0xff]  }
   0xd   :  { %2625 = vmatpush3.bf16.msra.mxu1 %v2663_v12  ;;  %v2661_v36 = vld [vmem:[%s3860_s0 + $0xd8] sm:$0xff]   ;;  %v2662_v37 = vld [vmem:[%s3860_s0 + $0xe0] sm:$0xff]   ;;  %v2664_v38 = vld [vmem:[%s3860_s0 + $0xe8] sm:$0xff]  }
   0xe   :  { %2476 = vmatmul.mubr.msk.bf16.gmra.mxu0 %vm260_vm0, %v2635_v4  ;;  %2618 = vmatprep.subr.bf16.mxu1 %v2667_v15  ;;  %v2665_v39 = vld [vmem:[%s3860_s0 + $0xf0] sm:$0xff]   ;;  %v2666_v40 = vld [vmem:[%s3860_s0 + $0xf8] sm:$0xff]   ;;  %v3116_v43 = vld [vmem:[%s3862_s2] ss:$0 sm:$0xff] }
   0xf   :  { %2479 = vmatprep.mubr.msk.bf16.mxu0 %vm260_vm0, %v2636_v5  ;;  %2540 = vmatpush3.bf16.msra.mxu0 %v2663_v12 }
  0x10   :  { %2541 = vmatprep.subr.bf16.mxu0 %v2667_v15 }
  0x11   :  { %2626 = vmatpush3.bf16.msra.mxu1 %v2667_v15 }
  0x12   :  { %2619 = vmatprep.subr.bf16.mxu1 %v2668_v16 }
  0x13   :  { %2542 = vmatpush3.bf16.msra.mxu0 %v2667_v15 }
  0x14   :  { %2543 = vmatprep.subr.bf16.mxu0 %v2668_v16 }
  0x15   :  { %2627 = vmatpush3.bf16.msra.mxu1 %v2668_v16 }
  0x16   :  { %2480 = vmatmul.mubr.msk.bf16.gmra.mxu0 %vm260_vm0, %v2637_v6  ;;  %2620 = vmatprep.subr.bf16.mxu1 %v2669_v17 }
  0x17   :  { %2483 = vmatprep.mubr.msk.bf16.mxu0 %vm260_vm0, %v2638_v7  ;;  %2544 = vmatpush3.bf16.msra.mxu0 %v2668_v16 }
  0x18   :  { %2545 = vmatprep.subr.bf16.mxu0 %v2669_v17 }
  0x19   :  { %2628 = vmatpush3.bf16.msra.mxu1 %v2669_v17 }
  0x1a   :  { %2621 = vmatprep.subr.bf16.mxu1 %v2670_v20 }
  0x1b   :  { %2546 = vmatpush3.bf16.msra.mxu0 %v2669_v17 }
  0x1c   :  { %2547 = vmatprep.subr.bf16.mxu0 %v2670_v20 }
  0x1d   :  { %2629 = vmatpush3.bf16.msra.mxu1 %v2670_v20 }
  0x1e   :  { %2484 = vmatmul.mubr.msk.bf16.gmra.mxu0 %vm260_vm0, %v2639_v9  ;;  %2622 = vmatprep.subr.bf16.mxu1 %v2671_v21 }
  0x1f   :  { %2487 = vmatprep.mubr.msk.bf16.mxu0 %vm260_vm0, %v2640_v10  ;;  %2548 = vmatpush3.bf16.msra.mxu0 %v2670_v20 }
  0x20   :  { %2549 = vmatprep.subr.bf16.mxu0 %v2671_v21 }
  0x21   :  { %2630 = vmatpush3.bf16.msra.mxu1 %v2671_v21 }
  0x23   :  { %2550 = vmatpush3.bf16.msra.mxu0 %v2671_v21 }
  0x26   :  { %2488 = vmatmul.mubr.msk.bf16.gmra.mxu0 %vm260_vm0, %v2641_v13 }
  0x27   :  { %2491 = vmatprep.mubr.msk.bf16.mxu0 %vm260_vm0, %v2642_v14 }
  0x2e   :  { %2492 = vmatmul.mubr.msk.bf16.gmra.mxu0 %vm260_vm0, %v2643_v18 }
  0x2f   :  { %2495 = vmatprep.mubr.msk.bf16.mxu0 %vm260_vm0, %v2644_v19 }
  0x36   :  { %2496 = vmatmul.mubr.msk.bf16.gmra.mxu0 %vm260_vm0, %v2645_v22 }
  0x37   :  { %2499 = vmatprep.mubr.msk.bf16.mxu0 %vm260_vm0, %v2646_v23 }
  0x3e   :  { %2500 = vmatmul.mubr.msk.bf16.gmra.mxu0 %vm260_vm0, %v2647_v24 }
  0x3f   :  { %2503 = vmatprep.mubr.msk.bf16.mxu0 %vm260_vm0, %v2648_v25 }
  0x46   :  { %2504 = vmatmul.mubr.msk.bf16.gmra.mxu0 %vm260_vm0, %v2649_v26 }
  0x47   :  { %2507 = vmatprep.mubr.msk.bf16.mxu0 %vm260_vm0, %v2650_v27 }
  0x4e   :  { %2508 = vmatmul.mubr.msk.bf16.gmra.mxu0 %vm260_vm0, %v2651_v28 }
  0x4f   :  { %2511 = vmatprep.mubr.msk.bf16.mxu0 %vm260_vm0, %v2652_v29 }
  0x56   :  { %2512 = vmatmul.mubr.msk.bf16.gmra.mxu0 %vm260_vm0, %v2654_v30 }
  0x57   :  { %2515 = vmatprep.mubr.msk.bf16.mxu0 %vm260_vm0, %v2655_v31 }
  0x5e   :  { %2516 = vmatmul.mubr.msk.bf16.gmra.mxu0 %vm260_vm0, %v2656_v32 }
  0x5f   :  { %2519 = vmatprep.mubr.msk.bf16.mxu0 %vm260_vm0, %v2657_v33 }
  0x66   :  { %2520 = vmatmul.mubr.msk.bf16.gmra.mxu0 %vm260_vm0, %v2659_v34 }
  0x67   :  { %2523 = vmatprep.mubr.msk.bf16.mxu0 %vm260_vm0, %v2660_v35 }
  0x6e   :  { %2524 = vmatmul.mubr.msk.bf16.gmra.mxu0 %vm260_vm0, %v2661_v36 }
  0x6f   :  { %2527 = vmatprep.mubr.msk.bf16.mxu0 %vm260_vm0, %v2662_v37 }
  0x76   :  { %2528 = vmatmul.mubr.msk.bf16.gmra.mxu0 %vm260_vm0, %v2664_v38 }
  0x77   :  { %2531 = vmatprep.mubr.msk.bf16.mxu0 %vm260_vm0, %v2665_v39 }
  0x7e   :  { %2532 = vmatmul.mubr.msk.bf16.gmra.mxu0 %vm260_vm0, %v2666_v40 }
  0xc6   :  { %v2473_v41 = vpop.f32.mrf.mxu0 }
  0xc7   :  { %v400_v47 = vadd.f32 %v2473_v41, %v3116_v43 }
  0xc8   :  { %v391_v42 = vpop.f32.mrf.mxu0 }
  0xc9   :  { %v392_v45 = vadd.f32 %v3116_v43, %v391_v42  ;;  %v648_v54 = vmax.f32 %v400_v47, 0.0 }
  0xca   :  { %v2474_v44 = vpop.f32.mrf.mxu0 }
  0xcb   :  { %v403_v46 = vadd.f32 %v2474_v44, %v3116_v43  ;;  %v646_v52 = vmax.f32 %v392_v45, 0.0 }
  0xcc   :  { %v394_v48 = vpop.f32.mrf.mxu0 }
  0xcd   :  { %v395_v49 = vadd.f32 %v3116_v43, %v394_v48  ;;  %v649_v50 = vmax.f32 %v403_v46, 0.0 }
  0xce   :  { %v2477_v51 = vpop.f32.mrf.mxu0 }
  0xcf   :  { %v647_v53 = vmax.f32 %v395_v49, 0.0  ;;  %v711_v57 = vpack.c.bf16 %v649_v50, %v648_v54  ;;  %v416_v61 = vadd.f32 %v2477_v51, %v3116_v43 }
  0xd0   :  { %v407_v55 = vpop.f32.mrf.mxu0 }
  0xd1   :  { %v710_v56 = vpack.c.bf16 %v647_v53, %v646_v52  ;;  %v408_v59 = vadd.f32 %v3116_v43, %v407_v55  ;;  %v652_v4 = vmax.f32 %v416_v61, 0.0 }
  0xd2   :  { %v2478_v58 = vpop.f32.mrf.mxu0 }
  0xd3   :  { %v419_v60 = vadd.f32 %v2478_v58, %v3116_v43  ;;  %2551 = vmatprep.mubr.bf16.mxu0 %v710_v56  ;;  %v650_v2 = vmax.f32 %v408_v59, 0.0 }
  0xd4   :  { %v410_v62 = vpop.f32.mrf.mxu0  ;;  %2552 = vmatmul.mubr.bf16.vlgmr.msra.gmra.mxu0 %v711_v57 }
  0xd5   :  { %v411_v63 = vadd.f32 %v3116_v43, %v410_v62  ;;  %v653_v0 = vmax.f32 %v419_v60, 0.0 }
  0xd6   :  { %v2481_v1 = vpop.f32.mrf.mxu0 }
  0xd7   :  { %v651_v3 = vmax.f32 %v411_v63, 0.0  ;;  %v713_v7 = vpack.c.bf16 %v653_v0, %v652_v4  ;;  %v432_v11 = vadd.f32 %v2481_v1, %v3116_v43 }
  0xd8   :  { %v423_v5 = vpop.f32.mrf.mxu0 }
  0xd9   :  { %v712_v6 = vpack.c.bf16 %v651_v3, %v650_v2  ;;  %v424_v9 = vadd.f32 %v3116_v43, %v423_v5  ;;  %v656_v18 = vmax.f32 %v432_v11, 0.0 }
  0xda   :  { %v2482_v8 = vpop.f32.mrf.mxu0 }
  0xdb   :  { %v435_v10 = vadd.f32 %v2482_v8, %v3116_v43  ;;  %2555 = vmatprep.mubr.bf16.mxu1 %v712_v6  ;;  %v654_v16 = vmax.f32 %v424_v9, 0.0 }
  0xdc   :  { %v426_v12 = vpop.f32.mrf.mxu0  ;;  %2556 = vmatmul.mubr.bf16.vlgmr.msra.gmra.mxu1 %v713_v7 }
  0xdd   :  { %v427_v13 = vadd.f32 %v3116_v43, %v426_v12  ;;  %v657_v14 = vmax.f32 %v435_v10, 0.0 }
  0xde   :  { %v2485_v15 = vpop.f32.mrf.mxu0 }
  0xdf   :  { %v655_v17 = vmax.f32 %v427_v13, 0.0  ;;  %v715_v21 = vpack.c.bf16 %v657_v14, %v656_v18  ;;  %v448_v25 = vadd.f32 %v2485_v15, %v3116_v43 }
  0xe0   :  { %v439_v19 = vpop.f32.mrf.mxu0 }
  0xe1   :  { %v714_v20 = vpack.c.bf16 %v655_v17, %v654_v16  ;;  %v440_v23 = vadd.f32 %v3116_v43, %v439_v19  ;;  %v660_v32 = vmax.f32 %v448_v25, 0.0 }
  0xe2   :  { %v2486_v22 = vpop.f32.mrf.mxu0 }
  0xe3   :  { %v451_v24 = vadd.f32 %v2486_v22, %v3116_v43  ;;  %2559 = vmatprep.mubr.bf16.mxu1 %v714_v20  ;;  %v658_v30 = vmax.f32 %v440_v23, 0.0 }
  0xe4   :  { %v442_v26 = vpop.f32.mrf.mxu0  ;;  %2560 = vmatmul.mubr.bf16.gmra.mxu1 %v715_v21 }
  0xe5   :  { %v443_v27 = vadd.f32 %v3116_v43, %v442_v26  ;;  %v661_v28 = vmax.f32 %v451_v24, 0.0 }
  0xe6   :  { %v2489_v29 = vpop.f32.mrf.mxu0 }
  0xe7   :  { %v659_v31 = vmax.f32 %v443_v27, 0.0  ;;  %v717_v35 = vpack.c.bf16 %v661_v28, %v660_v32  ;;  %v464_v39 = vadd.f32 %v2489_v29, %v3116_v43 }
  0xe8   :  { %v455_v33 = vpop.f32.mrf.mxu0 }
  0xe9   :  { %v716_v34 = vpack.c.bf16 %v659_v31, %v658_v30  ;;  %v456_v37 = vadd.f32 %v3116_v43, %v455_v33  ;;  %v664_v47 = vmax.f32 %v464_v39, 0.0 }
  0xea   :  { %v2490_v36 = vpop.f32.mrf.mxu0 }
  0xeb   :  { %v467_v38 = vadd.f32 %v2490_v36, %v3116_v43  ;;  %2563 = vmatprep.mubr.bf16.mxu1 %v716_v34  ;;  %v662_v45 = vmax.f32 %v456_v37, 0.0 }
  0xec   :  { %v458_v40 = vpop.f32.mrf.mxu0  ;;  %2564 = vmatmul.mubr.bf16.gmra.mxu1 %v717_v35 }
  0xed   :  { %v459_v41 = vadd.f32 %v3116_v43, %v458_v40  ;;  %v665_v42 = vmax.f32 %v467_v38, 0.0 }
  0xee   :  { %v2493_v44 = vpop.f32.mrf.mxu0 }
  0xef   :  { %v663_v46 = vmax.f32 %v459_v41, 0.0  ;;  %v719_v50 = vpack.c.bf16 %v665_v42, %v664_v47  ;;  %v480_v54 = vadd.f32 %v2493_v44, %v3116_v43 }
  0xf0   :  { %v471_v48 = vpop.f32.mrf.mxu0 }
  0xf1   :  { %v718_v49 = vpack.c.bf16 %v663_v46, %v662_v45  ;;  %v472_v52 = vadd.f32 %v3116_v43, %v471_v48  ;;  %v668_v61 = vmax.f32 %v480_v54, 0.0 }
  0xf2   :  { %v2494_v51 = vpop.f32.mrf.mxu0 }
  0xf3   :  { %v483_v53 = vadd.f32 %v2494_v51, %v3116_v43  ;;  %2567 = vmatprep.mubr.bf16.mxu1 %v718_v49  ;;  %v666_v59 = vmax.f32 %v472_v52, 0.0 }
  0xf4   :  { %v474_v55 = vpop.f32.mrf.mxu0  ;;  %2568 = vmatmul.mubr.bf16.gmra.mxu1 %v719_v50 }
  0xf5   :  { %v475_v56 = vadd.f32 %v3116_v43, %v474_v55  ;;  %v669_v57 = vmax.f32 %v483_v53, 0.0 }
  0xf6   :  { %v2497_v58 = vpop.f32.mrf.mxu0 }
  0xf7   :  { %v667_v60 = vmax.f32 %v475_v56, 0.0  ;;  %v721_v0 = vpack.c.bf16 %v669_v57, %v668_v61  ;;  %v496_v4 = vadd.f32 %v2497_v58, %v3116_v43 }
  0xf8   :  { %v487_v62 = vpop.f32.mrf.mxu0 }
  0xf9   :  { %v720_v63 = vpack.c.bf16 %v667_v60, %v666_v59  ;;  %v488_v2 = vadd.f32 %v3116_v43, %v487_v62  ;;  %v672_v11 = vmax.f32 %v496_v4, 0.0 }
  0xfa   :  { %v2498_v1 = vpop.f32.mrf.mxu0 }
  0xfb   :  { %v499_v3 = vadd.f32 %v2498_v1, %v3116_v43  ;;  %2571 = vmatprep.mubr.bf16.mxu1 %v720_v63  ;;  %v670_v9 = vmax.f32 %v488_v2, 0.0 }
  0xfc   :  { %v490_v5 = vpop.f32.mrf.mxu0  ;;  %2572 = vmatmul.mubr.bf16.gmra.mxu1 %v721_v0 }
  0xfd   :  { %v491_v6 = vadd.f32 %v3116_v43, %v490_v5  ;;  %v673_v7 = vmax.f32 %v499_v3, 0.0 }
  0xfe   :  { %v2501_v8 = vpop.f32.mrf.mxu0 }
  0xff   :  { %v671_v10 = vmax.f32 %v491_v6, 0.0  ;;  %v723_v14 = vpack.c.bf16 %v673_v7, %v672_v11  ;;  %v512_v18 = vadd.f32 %v2501_v8, %v3116_v43 }
 0x100   :  { %v503_v12 = vpop.f32.mrf.mxu0 }
 0x101   :  { %v722_v13 = vpack.c.bf16 %v671_v10, %v670_v9  ;;  %v504_v16 = vadd.f32 %v3116_v43, %v503_v12  ;;  %v676_v25 = vmax.f32 %v512_v18, 0.0 }
 0x102   :  { %v2502_v15 = vpop.f32.mrf.mxu0 }
 0x103   :  { %v515_v17 = vadd.f32 %v2502_v15, %v3116_v43  ;;  %2575 = vmatprep.mubr.bf16.mxu1 %v722_v13  ;;  %v674_v23 = vmax.f32 %v504_v16, 0.0 }
 0x104   :  { %v506_v19 = vpop.f32.mrf.mxu0  ;;  %2576 = vmatmul.mubr.bf16.gmra.mxu1 %v723_v14 }
 0x105   :  { %v507_v20 = vadd.f32 %v3116_v43, %v506_v19  ;;  %v677_v21 = vmax.f32 %v515_v17, 0.0 }
 0x106   :  { %v2505_v22 = vpop.f32.mrf.mxu0 }
 0x107   :  { %v675_v24 = vmax.f32 %v507_v20, 0.0  ;;  %v725_v28 = vpack.c.bf16 %v677_v21, %v676_v25  ;;  %v528_v32 = vadd.f32 %v2505_v22, %v3116_v43 }
 0x108   :  { %v519_v26 = vpop.f32.mrf.mxu0 }
 0x109   :  { %v724_v27 = vpack.c.bf16 %v675_v24, %v674_v23  ;;  %v520_v30 = vadd.f32 %v3116_v43, %v519_v26  ;;  %v680_v39 = vmax.f32 %v528_v32, 0.0 }
 0x10a   :  { %v2506_v29 = vpop.f32.mrf.mxu0 }
 0x10b   :  { %v531_v31 = vadd.f32 %v2506_v29, %v3116_v43  ;;  %2579 = vmatprep.mubr.bf16.mxu1 %v724_v27  ;;  %v678_v37 = vmax.f32 %v520_v30, 0.0 }
 0x10c   :  { %v522_v33 = vpop.f32.mrf.mxu0  ;;  %2580 = vmatmul.mubr.bf16.gmra.mxu1 %v725_v28 }
 0x10d   :  { %v523_v34 = vadd.f32 %v3116_v43, %v522_v33  ;;  %v681_v35 = vmax.f32 %v531_v31, 0.0 }
 0x10e   :  { %v2509_v36 = vpop.f32.mrf.mxu0 }
 0x10f   :  { %v679_v38 = vmax.f32 %v523_v34, 0.0  ;;  %v727_v42 = vpack.c.bf16 %v681_v35, %v680_v39  ;;  %v544_v47 = vadd.f32 %v2509_v36, %v3116_v43 }
 0x110   :  { %v535_v40 = vpop.f32.mrf.mxu0 }
 0x111   :  { %v726_v41 = vpack.c.bf16 %v679_v38, %v678_v37  ;;  %v536_v45 = vadd.f32 %v3116_v43, %v535_v40  ;;  %v684_v54 = vmax.f32 %v544_v47, 0.0 }
 0x112   :  { %v2510_v44 = vpop.f32.mrf.mxu0 }
 0x113   :  { %v547_v46 = vadd.f32 %v2510_v44, %v3116_v43  ;;  %2583 = vmatprep.mubr.bf16.mxu1 %v726_v41  ;;  %v682_v52 = vmax.f32 %v536_v45, 0.0 }
 0x114   :  { %v538_v48 = vpop.f32.mrf.mxu0  ;;  %2584 = vmatmul.mubr.bf16.gmra.mxu1 %v727_v42 }
 0x115   :  { %v539_v49 = vadd.f32 %v3116_v43, %v538_v48  ;;  %v685_v50 = vmax.f32 %v547_v46, 0.0 }
 0x116   :  { %v2513_v51 = vpop.f32.mrf.mxu0 }
 0x117   :  { %v683_v53 = vmax.f32 %v539_v49, 0.0  ;;  %v729_v57 = vpack.c.bf16 %v685_v50, %v684_v54  ;;  %v560_v61 = vadd.f32 %v2513_v51, %v3116_v43 }
 0x118   :  { %v551_v55 = vpop.f32.mrf.mxu0 }
 0x119   :  { %v728_v56 = vpack.c.bf16 %v683_v53, %v682_v52  ;;  %v552_v59 = vadd.f32 %v3116_v43, %v551_v55  ;;  %v688_v4 = vmax.f32 %v560_v61, 0.0 }
 0x11a   :  { %v2514_v58 = vpop.f32.mrf.mxu0 }
 0x11b   :  { %v563_v60 = vadd.f32 %v2514_v58, %v3116_v43  ;;  %2587 = vmatprep.mubr.bf16.mxu1 %v728_v56  ;;  %v686_v2 = vmax.f32 %v552_v59, 0.0 }
 0x11c   :  { %v554_v62 = vpop.f32.mrf.mxu0  ;;  %2588 = vmatmul.mubr.bf16.gmra.mxu1 %v729_v57 }
 0x11d   :  { %v555_v63 = vadd.f32 %v3116_v43, %v554_v62  ;;  %v689_v0 = vmax.f32 %v563_v60, 0.0 }
 0x11e   :  { %v2517_v1 = vpop.f32.mrf.mxu0 }
 0x11f   :  { %v687_v3 = vmax.f32 %v555_v63, 0.0  ;;  %v731_v7 = vpack.c.bf16 %v689_v0, %v688_v4  ;;  %v576_v11 = vadd.f32 %v2517_v1, %v3116_v43 }
 0x120   :  { %v567_v5 = vpop.f32.mrf.mxu0 }
 0x121   :  { %v730_v6 = vpack.c.bf16 %v687_v3, %v686_v2  ;;  %v568_v9 = vadd.f32 %v3116_v43, %v567_v5  ;;  %v692_v18 = vmax.f32 %v576_v11, 0.0 }
 0x122   :  { %v2518_v8 = vpop.f32.mrf.mxu0 }
 0x123   :  { %v579_v10 = vadd.f32 %v2518_v8, %v3116_v43  ;;  %2591 = vmatprep.mubr.bf16.mxu1 %v730_v6  ;;  %v690_v16 = vmax.f32 %v568_v9, 0.0 }
 0x124   :  { %v570_v12 = vpop.f32.mrf.mxu0  ;;  %2592 = vmatmul.mubr.bf16.gmra.mxu1 %v731_v7 }
 0x125   :  { %v571_v13 = vadd.f32 %v3116_v43, %v570_v12  ;;  %v693_v14 = vmax.f32 %v579_v10, 0.0 }
 0x126   :  { %v2521_v15 = vpop.f32.mrf.mxu0 }
 0x127   :  { %v691_v17 = vmax.f32 %v571_v13, 0.0  ;;  %v733_v21 = vpack.c.bf16 %v693_v14, %v692_v18  ;;  %v592_v25 = vadd.f32 %v2521_v15, %v3116_v43  ;;  %v3185_v13 = vld [vmem:[%s3863_s4] ss:$0 sm:$0xff] }
 0x128   :  { %v583_v19 = vpop.f32.mrf.mxu0 }
 0x129   :  { %v732_v20 = vpack.c.bf16 %v691_v17, %v690_v16  ;;  %v584_v23 = vadd.f32 %v3116_v43, %v583_v19  ;;  %v696_v32 = vmax.f32 %v592_v25, 0.0 }
 0x12a   :  { %v2522_v22 = vpop.f32.mrf.mxu0 }
 0x12b   :  { %v595_v24 = vadd.f32 %v2522_v22, %v3116_v43  ;;  %2595 = vmatprep.mubr.bf16.mxu1 %v732_v20  ;;  %v694_v30 = vmax.f32 %v584_v23, 0.0 }
 0x12c   :  { %v586_v26 = vpop.f32.mrf.mxu0  ;;  %2596 = vmatmul.mubr.bf16.gmra.mxu1 %v733_v21 }
 0x12d   :  { %v587_v27 = vadd.f32 %v3116_v43, %v586_v26  ;;  %v697_v28 = vmax.f32 %v595_v24, 0.0 }
 0x12e   :  { %v2525_v29 = vpop.f32.mrf.mxu0 }
 0x12f   :  { %v695_v31 = vmax.f32 %v587_v27, 0.0  ;;  %v735_v35 = vpack.c.bf16 %v697_v28, %v696_v32  ;;  %v608_v39 = vadd.f32 %v2525_v29, %v3116_v43 }
 0x130   :  { %v599_v33 = vpop.f32.mrf.mxu0 }
 0x131   :  { %v734_v34 = vpack.c.bf16 %v695_v31, %v694_v30  ;;  %v600_v37 = vadd.f32 %v3116_v43, %v599_v33  ;;  %v700_v47 = vmax.f32 %v608_v39, 0.0 }
 0x132   :  { %v2526_v36 = vpop.f32.mrf.mxu0 }
 0x133   :  { %v611_v38 = vadd.f32 %v2526_v36, %v3116_v43  ;;  %2599 = vmatprep.mubr.bf16.mxu1 %v734_v34  ;;  %v698_v45 = vmax.f32 %v600_v37, 0.0 }
 0x134   :  { %v602_v40 = vpop.f32.mrf.mxu0  ;;  %2600 = vmatmul.mubr.bf16.gmra.mxu1 %v735_v35 }
 0x135   :  { %v603_v41 = vadd.f32 %v3116_v43, %v602_v40  ;;  %v701_v42 = vmax.f32 %v611_v38, 0.0 }
 0x136   :  { %v2529_v44 = vpop.f32.mrf.mxu0 }
 0x137   :  { %v699_v46 = vmax.f32 %v603_v41, 0.0  ;;  %v737_v50 = vpack.c.bf16 %v701_v42, %v700_v47  ;;  %v624_v54 = vadd.f32 %v2529_v44, %v3116_v43 }
 0x138   :  { %v615_v48 = vpop.f32.mrf.mxu0 }
 0x139   :  { %v736_v49 = vpack.c.bf16 %v699_v46, %v698_v45  ;;  %v616_v52 = vadd.f32 %v3116_v43, %v615_v48  ;;  %v704_v61 = vmax.f32 %v624_v54, 0.0 }
 0x13a   :  { %v2530_v51 = vpop.f32.mrf.mxu0 }
 0x13b   :  { %v627_v53 = vadd.f32 %v2530_v51, %v3116_v43  ;;  %2603 = vmatprep.mubr.bf16.mxu1 %v736_v49  ;;  %v702_v59 = vmax.f32 %v616_v52, 0.0 }
 0x13c   :  { %v618_v55 = vpop.f32.mrf.mxu0  ;;  %2604 = vmatmul.mubr.bf16.gmra.mxu1 %v737_v50 }
 0x13d   :  { %v619_v56 = vadd.f32 %v3116_v43, %v618_v55  ;;  %v705_v57 = vmax.f32 %v627_v53, 0.0 }
 0x13e   :  { %v2533_v58 = vpop.f32.mrf.mxu0 }
 0x13f   :  { %v703_v60 = vmax.f32 %v619_v56, 0.0  ;;  %v739_v0 = vpack.c.bf16 %v705_v57, %v704_v61  ;;  %v640_v4 = vadd.f32 %v2533_v58, %v3116_v43 }
 0x140   :  { %v631_v62 = vpop.f32.mrf.mxu0 }
 0x141   :  { %v738_v63 = vpack.c.bf16 %v703_v60, %v702_v59  ;;  %v632_v2 = vadd.f32 %v3116_v43, %v631_v62  ;;  %v708_v10 = vmax.f32 %v640_v4, 0.0 }
 0x142   :  { %v2534_v1 = vpop.f32.mrf.mxu0 }
 0x143   :  { %v643_v3 = vadd.f32 %v2534_v1, %v3116_v43  ;;  %2607 = vmatprep.mubr.bf16.mxu1 %v738_v63  ;;  %v706_v8 = vmax.f32 %v632_v2, 0.0 }
 0x144   :  { %v634_v5 = vpop.f32.mrf.mxu0  ;;  %2608 = vmatmul.mubr.bf16.gmra.mxu1 %v739_v0 }
 0x145   :  { %v635_v6 = vadd.f32 %v3116_v43, %v634_v5  ;;  %v709_v7 = vmax.f32 %v643_v3, 0.0 }
 0x147   :  { %v707_v9 = vmax.f32 %v635_v6, 0.0  ;;  %v741_v12 = vpack.c.bf16 %v709_v7, %v708_v10 }
 0x149   :  { %v740_v11 = vpack.c.bf16 %v707_v9, %v706_v8 }
 0x14b   :  { %2611 = vmatprep.mubr.bf16.mxu1 %v740_v11 }
 0x14c   :  { %2612 = vmatmul.mubr.bf16.gmra.mxu1 %v741_v12 }
 0x194   :  { %v2553_v14 = vpop.f32.mrf.mxu0 }
 0x195   :  { %v3188_v15 = vadd.f32 %v2553_v14, %v3185_v13 }
 0x196   :  { %v847_v16 = vpop.f32.mrf.mxu0 }
 0x197   :  { %v3191_v43 = vadd.f32 %v3185_v13, %v847_v16  ;;  %1106 = vmax.xlane.f32.xlu1 %v3188_v15 }
 0x198   :  { %v2554_v17 = vpop.f32.mrf.mxu0 }
 0x199   :  { %v3195_v18 = vadd.f32 %v2554_v17, %v3185_v13  ;;  %1102 = vmax.xlane.f32.xlu0 %v3191_v43 }
 0x19a   :  { %v850_v19 = vpop.f32.mrf.mxu0 }
 0x19b   :  { %v3199_v20 = vadd.f32 %v3185_v13, %v850_v19  ;;  %1108 = vmax.xlane.f32.xlu1 %v3195_v18 }
 0x19c   :  { %v2557_v21 = vpop.f32.mrf.mxu1 }
 0x19d   :  { %1104 = vmax.xlane.f32.xlu0 %v3199_v20  ;;  %v3204_v23 = vadd.f32 %v2557_v21, %v3185_v13 }
 0x19e   :  { %v863_v22 = vpop.f32.mrf.mxu1 }
 0x19f   :  { %v3211_v27 = vadd.f32 %v3185_v13, %v863_v22 }
 0x1a0   :  { %v2558_v24 = vpop.f32.mrf.mxu1 }
 0x1a1   :  { %v3207_v25 = vadd.f32 %v2558_v24, %v3185_v13  ;;  %1114 = vmax.xlane.f32.xlu0 %v3204_v23 }
 0x1a2   :  { %v866_v26 = vpop.f32.mrf.mxu1 }
 0x1a3   :  { %1116 = vmax.xlane.f32.xlu1 %v3207_v25  ;;  %v3215_v29 = vadd.f32 %v3185_v13, %v866_v26 }
 0x1a4   :  { %v2561_v28 = vpop.f32.mrf.mxu1 }
 0x1a5   :  { %1110 = vmax.xlane.f32.xlu0 %v3211_v27  ;;  %v3219_v31 = vadd.f32 %v2561_v28, %v3185_v13 }
 0x1a6   :  { %v879_v30 = vpop.f32.mrf.mxu1 }
 0x1a7   :  { %1112 = vmax.xlane.f32.xlu1 %v3215_v29  ;;  %v3227_v35 = vadd.f32 %v3185_v13, %v879_v30 }
 0x1a8   :  { %v2562_v32 = vpop.f32.mrf.mxu1 }
 0x1a9   :  { %v3223_v33 = vadd.f32 %v2562_v32, %v3185_v13  ;;  %1122 = vmax.xlane.f32.xlu0 %v3219_v31 }
 0x1aa   :  { %v882_v34 = vpop.f32.mrf.mxu1 }
 0x1ab   :  { %1124 = vmax.xlane.f32.xlu1 %v3223_v33  ;;  %v3231_v37 = vadd.f32 %v3185_v13, %v882_v34 }
 0x1ac   :  { %v2565_v36 = vpop.f32.mrf.mxu1 }
 0x1ad   :  { %1118 = vmax.xlane.f32.xlu0 %v3227_v35  ;;  %v3235_v39 = vadd.f32 %v2565_v36, %v3185_v13 }
 0x1ae   :  { %v895_v38 = vpop.f32.mrf.mxu1 }
 0x1af   :  { %1120 = vmax.xlane.f32.xlu1 %v3231_v37  ;;  %v3243_v44 = vadd.f32 %v3185_v13, %v895_v38 }
 0x1b0   :  { %v2566_v40 = vpop.f32.mrf.mxu1 }
 0x1b1   :  { %v3239_v41 = vadd.f32 %v2566_v40, %v3185_v13  ;;  %1130 = vmax.xlane.f32.xlu0 %v3235_v39 }
 0x1b2   :  { %v898_v42 = vpop.f32.mrf.mxu1 }
 0x1b3   :  { %1132 = vmax.xlane.f32.xlu1 %v3239_v41  ;;  %v3247_v46 = vadd.f32 %v3185_v13, %v898_v42 }
 0x1b4   :  { %v2569_v45 = vpop.f32.mrf.mxu1 }
 0x1b5   :  { %1126 = vmax.xlane.f32.xlu0 %v3243_v44  ;;  %v3251_v48 = vadd.f32 %v2569_v45, %v3185_v13 }
 0x1b6   :  { %v911_v47 = vpop.f32.mrf.mxu1 }
 0x1b7   :  { %1128 = vmax.xlane.f32.xlu1 %v3247_v46  ;;  %v3259_v52 = vadd.f32 %v3185_v13, %v911_v47 }
 0x1b8   :  { %v2570_v49 = vpop.f32.mrf.mxu1 }
 0x1b9   :  { %v3255_v50 = vadd.f32 %v2570_v49, %v3185_v13  ;;  %1138 = vmax.xlane.f32.xlu0 %v3251_v48 }
 0x1ba   :  { %v914_v51 = vpop.f32.mrf.mxu1 }
 0x1bb   :  { %1140 = vmax.xlane.f32.xlu1 %v3255_v50  ;;  %v3263_v54 = vadd.f32 %v3185_v13, %v914_v51 }
 0x1bc   :  { %v2573_v53 = vpop.f32.mrf.mxu1 }
 0x1bd   :  { %1134 = vmax.xlane.f32.xlu0 %v3259_v52  ;;  %v3267_v56 = vadd.f32 %v2573_v53, %v3185_v13 }
 0x1be   :  { %v927_v55 = vpop.f32.mrf.mxu1 }
 0x1bf   :  { %1136 = vmax.xlane.f32.xlu1 %v3263_v54  ;;  %v3275_v60 = vadd.f32 %v3185_v13, %v927_v55 }
 0x1c0   :  { %v2574_v57 = vpop.f32.mrf.mxu1 }
 0x1c1   :  { %v3271_v58 = vadd.f32 %v2574_v57, %v3185_v13  ;;  %1146 = vmax.xlane.f32.xlu0 %v3267_v56 }
 0x1c2   :  { %v930_v59 = vpop.f32.mrf.mxu1 }
 0x1c3   :  { %1148 = vmax.xlane.f32.xlu1 %v3271_v58  ;;  %v3279_v62 = vadd.f32 %v3185_v13, %v930_v59 }
 0x1c4   :  { %v2577_v61 = vpop.f32.mrf.mxu1 }
 0x1c5   :  { %1142 = vmax.xlane.f32.xlu0 %v3275_v60  ;;  %v3283_v0 = vadd.f32 %v2577_v61, %v3185_v13 }
 0x1c6   :  { %v943_v63 = vpop.f32.mrf.mxu1 }
 0x1c7   :  { %1144 = vmax.xlane.f32.xlu1 %v3279_v62  ;;  %v3291_v4 = vadd.f32 %v3185_v13, %v943_v63 }
 0x1c8   :  { %v2578_v1 = vpop.f32.mrf.mxu1 }
 0x1c9   :  { %v3287_v2 = vadd.f32 %v2578_v1, %v3185_v13  ;;  %1154 = vmax.xlane.f32.xlu0 %v3283_v0 }
 0x1ca   :  { %v946_v3 = vpop.f32.mrf.mxu1 }
 0x1cb   :  { %1156 = vmax.xlane.f32.xlu1 %v3287_v2  ;;  %v3295_v6 = vadd.f32 %v3185_v13, %v946_v3 }
 0x1cc   :  { %v2581_v5 = vpop.f32.mrf.mxu1 }
 0x1cd   :  { %1150 = vmax.xlane.f32.xlu0 %v3291_v4  ;;  %v3299_v8 = vadd.f32 %v2581_v5, %v3185_v13 }
 0x1ce   :  { %v959_v7 = vpop.f32.mrf.mxu1 }
 0x1cf   :  { %1152 = vmax.xlane.f32.xlu1 %v3295_v6  ;;  %v3307_v12 = vadd.f32 %v3185_v13, %v959_v7 }
 0x1d0   :  { %v2582_v9 = vpop.f32.mrf.mxu1 }
 0x1d1   :  { %v3303_v10 = vadd.f32 %v2582_v9, %v3185_v13  ;;  %1162 = vmax.xlane.f32.xlu0 %v3299_v8 }
 0x1d2   :  { %v962_v11 = vpop.f32.mrf.mxu1 }
 0x1d3   :  { %1164 = vmax.xlane.f32.xlu1 %v3303_v10  ;;  %v3311_v16 = vadd.f32 %v3185_v13, %v962_v11 }
 0x1d4   :  { %v2585_v14 = vpop.f32.mrf.mxu1 }
 0x1d5   :  { %1158 = vmax.xlane.f32.xlu0 %v3307_v12  ;;  %v3315_v19 = vadd.f32 %v2585_v14, %v3185_v13 }
 0x1d6   :  { %v975_v17 = vpop.f32.mrf.mxu1 }
 0x1d7   :  { %1160 = vmax.xlane.f32.xlu1 %v3311_v16  ;;  %v3323_v26 = vadd.f32 %v3185_v13, %v975_v17 }
 0x1d8   :  { %v2586_v21 = vpop.f32.mrf.mxu1 }
 0x1d9   :  { %v3319_v22 = vadd.f32 %v2586_v21, %v3185_v13  ;;  %1170 = vmax.xlane.f32.xlu0 %v3315_v19 }
 0x1da   :  { %v978_v24 = vpop.f32.mrf.mxu1 }
 0x1db   :  { %1172 = vmax.xlane.f32.xlu1 %v3319_v22  ;;  %v3327_v30 = vadd.f32 %v3185_v13, %v978_v24 }
 0x1dc   :  { %v2589_v28 = vpop.f32.mrf.mxu1 }
 0x1dd   :  { %1166 = vmax.xlane.f32.xlu0 %v3323_v26  ;;  %v3331_v34 = vadd.f32 %v2589_v28, %v3185_v13 }
 0x1de   :  { %v991_v32 = vpop.f32.mrf.mxu1 }
 0x1df   :  { %1168 = vmax.xlane.f32.xlu1 %v3327_v30  ;;  %v3339_v42 = vadd.f32 %v3185_v13, %v991_v32 }
 0x1e0   :  { %v2590_v36 = vpop.f32.mrf.mxu1 }
 0x1e1   :  { %v3335_v38 = vadd.f32 %v2590_v36, %v3185_v13  ;;  %1178 = vmax.xlane.f32.xlu0 %v3331_v34 }
 0x1e2   :  { %v994_v40 = vpop.f32.mrf.mxu1 }
 0x1e3   :  { %1180 = vmax.xlane.f32.xlu1 %v3335_v38  ;;  %v3343_v47 = vadd.f32 %v3185_v13, %v994_v40 }
 0x1e4   :  { %v2593_v45 = vpop.f32.mrf.mxu1 }
 0x1e5   :  { %1174 = vmax.xlane.f32.xlu0 %v3339_v42  ;;  %v3347_v51 = vadd.f32 %v2593_v45, %v3185_v13 }
 0x1e6   :  { %v1007_v49 = vpop.f32.mrf.mxu1 }
 0x1e7   :  { %1176 = vmax.xlane.f32.xlu1 %v3343_v47  ;;  %v3355_v59 = vadd.f32 %v3185_v13, %v1007_v49 }
 0x1e8   :  { %v2594_v53 = vpop.f32.mrf.mxu1 }
 0x1e9   :  { %v3351_v55 = vadd.f32 %v2594_v53, %v3185_v13  ;;  %1186 = vmax.xlane.f32.xlu0 %v3347_v51 }
 0x1ea   :  { %v1010_v57 = vpop.f32.mrf.mxu1 }
 0x1eb   :  { %1188 = vmax.xlane.f32.xlu1 %v3351_v55  ;;  %v3359_v63 = vadd.f32 %v3185_v13, %v1010_v57 }
 0x1ec   :  { %v2597_v61 = vpop.f32.mrf.mxu1 }
 0x1ed   :  { %1182 = vmax.xlane.f32.xlu0 %v3355_v59  ;;  %v3363_v3 = vadd.f32 %v2597_v61, %v3185_v13 }
 0x1ee   :  { %v1023_v1 = vpop.f32.mrf.mxu1 }
 0x1ef   :  { %1184 = vmax.xlane.f32.xlu1 %v3359_v63  ;;  %v3371_v11 = vadd.f32 %v3185_v13, %v1023_v1 }
 0x1f0   :  { %v2598_v5 = vpop.f32.mrf.mxu1 }
 0x1f1   :  { %v3367_v7 = vadd.f32 %v2598_v5, %v3185_v13  ;;  %1194 = vmax.xlane.f32.xlu0 %v3363_v3 }
 0x1f2   :  { %v1026_v9 = vpop.f32.mrf.mxu1 }
 0x1f3   :  { %1196 = vmax.xlane.f32.xlu1 %v3367_v7  ;;  %v3375_v17 = vadd.f32 %v3185_v13, %v1026_v9 }
 0x1f4   :  { %v2601_v14 = vpop.f32.mrf.mxu1 }
 0x1f5   :  { %1190 = vmax.xlane.f32.xlu0 %v3371_v11  ;;  %v3379_v24 = vadd.f32 %v2601_v14, %v3185_v13 }
 0x1f6   :  { %v1039_v21 = vpop.f32.mrf.mxu1 }
 0x1f7   :  { %1192 = vmax.xlane.f32.xlu1 %v3375_v17  ;;  %v3387_v40 = vadd.f32 %v3185_v13, %v1039_v21 }
 0x1f8   :  { %v2602_v28 = vpop.f32.mrf.mxu1 }
 0x1f9   :  { %v3383_v32 = vadd.f32 %v2602_v28, %v3185_v13  ;;  %1202 = vmax.xlane.f32.xlu0 %v3379_v24  ;;  %3892 = vst [vmem:[#allocation2_spill] sm:$0xff] %v3387_v40 }
 0x1fa   :  { %v1042_v36 = vpop.f32.mrf.mxu1 }
 0x1fb   :  { %1204 = vmax.xlane.f32.xlu1 %v3383_v32  ;;  %v3391_v49 = vadd.f32 %v3185_v13, %v1042_v36 }
 0x1fc   :  { %v2605_v45 = vpop.f32.mrf.mxu1 }
 0x1fd   :  { %3893 = vst [vmem:[#allocation3_spill] sm:$0xff] %v3391_v49  ;;  %1198 = vmax.xlane.f32.xlu0 %v3387_v40  ;;  %v3395_v57 = vadd.f32 %v2605_v45, %v3185_v13 }
 0x1fe   :  { %v1055_v53 = vpop.f32.mrf.mxu1 }
 0x1ff   :  { %3894 = vst [vmem:[#allocation4_spill] sm:$0xff] %v3395_v57  ;;  %1200 = vmax.xlane.f32.xlu1 %v3391_v49  ;;  %v3403_v9 = vadd.f32 %v3185_v13, %v1055_v53 }
 0x200   :  { %v2606_v61 = vpop.f32.mrf.mxu1 }
 0x201   :  { %v3399_v1 = vadd.f32 %v2606_v61, %v3185_v13  ;;  %1210 = vmax.xlane.f32.xlu0 %v3395_v57  ;;  %3896 = vst [vmem:[#allocation6_spill] sm:$0xff] %v3403_v9 }
 0x202   :  { %v1058_v5 = vpop.f32.mrf.mxu1 }
 0x203   :  { %3895 = vst [vmem:[#allocation5_spill] sm:$0xff] %v3399_v1  ;;  %1212 = vmax.xlane.f32.xlu1 %v3399_v1  ;;  %v3407_v21 = vadd.f32 %v3185_v13, %v1058_v5 }
 0x204   :  { %v2609_v14 = vpop.f32.mrf.mxu1 }
 0x205   :  { %3897 = vst [vmem:[#allocation7_spill] sm:$0xff] %v3407_v21  ;;  %1206 = vmax.xlane.f32.xlu0 %v3403_v9  ;;  %v3411_v36 = vadd.f32 %v2609_v14, %v3185_v13 }
 0x206   :  { %v1071_v28 = vpop.f32.mrf.mxu1 }
 0x207   :  { %3898 = vst [vmem:[#allocation8_spill] sm:$0xff] %v3411_v36  ;;  %1208 = vmax.xlane.f32.xlu1 %v3407_v21  ;;  %v3419_v1 = vadd.f32 %v3185_v13, %v1071_v28 }
 0x208   :  { %v2610_v45 = vpop.f32.mrf.mxu1 }
 0x209   :  { %v3415_v61 = vadd.f32 %v2610_v45, %v3185_v13  ;;  %1218 = vmax.xlane.f32.xlu0 %v3411_v36  ;;  %3900 = vst [vmem:[#allocation10_spill] sm:$0xff] %v3419_v1 }
 0x20a   :  { %v1074_v53 = vpop.f32.mrf.mxu1 }
 0x20b   :  { %3899 = vst [vmem:[#allocation9_spill] sm:$0xff] %v3415_v61  ;;  %1220 = vmax.xlane.f32.xlu1 %v3415_v61  ;;  %v3423_v9 = vadd.f32 %v3185_v13, %v1074_v53 }
 0x20c   :  { %v2613_v5 = vpop.f32.mrf.mxu1 }
 0x20d   :  { %3901 = vst [vmem:[#allocation11_spill] sm:$0xff] %v3423_v9  ;;  %1214 = vmax.xlane.f32.xlu0 %v3419_v1  ;;  %v3427_v21 = vadd.f32 %v2613_v5, %v3185_v13 }
 0x20e   :  { %v1087_v14 = vpop.f32.mrf.mxu1 }
 0x20f   :  { %3902 = vst [vmem:[#allocation12_spill] sm:$0xff] %v3427_v21  ;;  %1216 = vmax.xlane.f32.xlu1 %v3423_v9  ;;  %v3435_v61 = vadd.f32 %v3185_v13, %v1087_v14 }
 0x210   :  { %v2614_v45 = vpop.f32.mrf.mxu1 }
 0x211   :  { %v3431_v36 = vadd.f32 %v2614_v45, %v3185_v13  ;;  %1226 = vmax.xlane.f32.xlu0 %v3427_v21  ;;  %3904 = vst [vmem:[#allocation14_spill] sm:$0xff] %v3435_v61 }
 0x212   :  { %v1090_v28 = vpop.f32.mrf.mxu1 }
 0x213   :  { %3903 = vst [vmem:[#allocation13_spill] sm:$0xff] %v3431_v36  ;;  %1228 = vmax.xlane.f32.xlu1 %v3431_v36  ;;  %v3439_v53 = vadd.f32 %v3185_v13, %v1090_v28 }
 0x215   :  { %3905 = vst [vmem:[#allocation15_spill] sm:$0xff] %v3439_v53  ;;  %1222 = vmax.xlane.f32.xlu0 %v3435_v61 }
 0x217   :  { %1224 = vmax.xlane.f32.xlu1 %v3439_v53 }
 0x220   :  { %v1107_v5 = vpop.xlane.xlu1 %1106 }
 0x221   :  { %v1232_v9 = vsub.f32 %v3188_v15, %v1107_v5 }
 0x222   :  { %v1103_v45 = vpop.xlane.xlu0 %1102 }
 0x223   :  { %v1298_v1 = vmul.f32 1.442695, %v1232_v9  ;;  %v1230_v21 = vsub.f32 %v3191_v43, %v1103_v45 }
 0x224   :  { %v1109_v57 = vpop.xlane.xlu1 %1108 }
 0x225   :  { %2672 = vpow2.f32 %v1298_v1  ;;  %v1294_v14 = vmul.f32 1.442695, %v1230_v21  ;;  %v1233_v49 = vsub.f32 %v3195_v18, %v1109_v57 }
 0x226   :  { %v1105_v36 = vpop.xlane.xlu0 %1104 }
 0x227   :  { %v1300_v40 = vmul.f32 1.442695, %v1233_v49  ;;  %v1231_v13 = vsub.f32 %v3199_v20, %v1105_v36  ;;  %2674 = vpow2.f32 %v1294_v14 }
 0x229   :  { %2676 = vpow2.f32 %v1300_v40  ;;  %v1296_v28 = vmul.f32 1.442695, %v1231_v13 }
 0x22a   :  { %v1115_v53 = vpop.xlane.xlu0 %1114 }
 0x22b   :  { %v1236_v61 = vsub.f32 %v3204_v23, %v1115_v53  ;;  %2678 = vpow2.f32 %v1296_v28 }
 0x22c   :  { %v1117_v15 = vpop.xlane.xlu1 %1116 }
 0x22d   :  { %v1306_v9 = vmul.f32 1.442695, %v1236_v61  ;;  %v1237_v43 = vsub.f32 %v3207_v25, %v1117_v15 }
 0x22e   :  { %v1111_v5 = vpop.xlane.xlu0 %1110 }
 0x22f   :  { %2680 = vpow2.f32 %v1306_v9  ;;  %v1308_v1 = vmul.f32 1.442695, %v1237_v43  ;;  %v1234_v18 = vsub.f32 %v3211_v27, %v1111_v5 }
 0x230   :  { %v1113_v57 = vpop.xlane.xlu1 %1112 }
 0x231   :  { %2682 = vpow2.f32 %v1308_v1  ;;  %v1302_v49 = vmul.f32 1.442695, %v1234_v18  ;;  %v1235_v20 = vsub.f32 %v3215_v29, %v1113_v57 }
 0x232   :  { %v3451_v40 = vpop.eup %2672  ;;  %v1123_v21 = vpop.xlane.xlu0 %1122 }
 0x233   :  { %2684 = vpow2.f32 %v1302_v49  ;;  %v1304_v23 = vmul.f32 1.442695, %v1235_v20  ;;  %v1240_v36 = vsub.f32 %v3219_v31, %v1123_v21  ;;  %1426 = vadd.xlane.f32.xlu0 %v3451_v40 }
 0x234   :  { %v1125_v25 = vpop.xlane.xlu1 %1124  ;;  %v3455_v61 = vpop.eup %2674 }
 0x235   :  { %2686 = vpow2.f32 %v1304_v23  ;;  %v1314_v53 = vmul.f32 1.442695, %v1240_v36  ;;  %v1241_v27 = vsub.f32 %v3223_v33, %v1125_v25 }
 0x236   :  { %v3458_v45 = vpop.eup %2676  ;;  %v1119_v14 = vpop.xlane.xlu0 %1118 }
 0x237   :  { %2688 = vpow2.f32 %v1314_v53  ;;  %v1316_v29 = vmul.f32 1.442695, %v1241_v27  ;;  %v1238_v13 = vsub.f32 %v3227_v35, %v1119_v14  ;;  %1428 = vadd.xlane.f32.xlu1 %v3458_v45  ;;  %1422 = vadd.xlane.f32.xlu0 %v3455_v61 }
 0x238   :  { %v1121_v31 = vpop.xlane.xlu1 %1120  ;;  %v3464_v9 = vpop.eup %2678 }
 0x239   :  { %2690 = vpow2.f32 %v1316_v29  ;;  %v1310_v28 = vmul.f32 1.442695, %v1238_v13  ;;  %v1239_v15 = vsub.f32 %v3231_v37, %v1121_v31 }
 0x23a   :  { %v1131_v43 = vpop.xlane.xlu0 %1130 }
 0x23b   :  { %2692 = vpow2.f32 %v1310_v28  ;;  %v1312_v33 = vmul.f32 1.442695, %v1239_v15  ;;  %v1244_v5 = vsub.f32 %v3235_v39, %v1131_v43  ;;  %1424 = vadd.xlane.f32.xlu1 %v3464_v9 }
 0x23c   :  { %v3468_v1 = vpop.eup %2680  ;;  %v1133_v35 = vpop.xlane.xlu1 %1132 }
 0x23d   :  { %2694 = vpow2.f32 %v1312_v33  ;;  %v1322_v18 = vmul.f32 1.442695, %v1244_v5  ;;  %v1245_v57 = vsub.f32 %v3239_v41, %v1133_v35  ;;  %1434 = vadd.xlane.f32.xlu0 %v3468_v1 }
 0x23e   :  { %v3472_v49 = vpop.eup %2682  ;;  %v1127_v37 = vpop.xlane.xlu0 %1126 }
 0x23f   :  { %2696 = vpow2.f32 %v1322_v18  ;;  %v1324_v20 = vmul.f32 1.442695, %v1245_v57  ;;  %v1242_v21 = vsub.f32 %v3243_v44, %v1127_v37  ;;  %1436 = vadd.xlane.f32.xlu1 %v3472_v49 }
 0x240   :  { %v3476_v39 = vpop.eup %2684  ;;  %v1129_v23 = vpop.xlane.xlu1 %1128 }
 0x241   :  { %2698 = vpow2.f32 %v1324_v20  ;;  %v1318_v36 = vmul.f32 1.442695, %v1242_v21  ;;  %v1243_v25 = vsub.f32 %v3247_v46, %v1129_v23  ;;  %1430 = vadd.xlane.f32.xlu0 %v3476_v39 }
 0x242   :  { %v3480_v41 = vpop.eup %2686  ;;  %v1139_v53 = vpop.xlane.xlu0 %1138 }
 0x243   :  { %2700 = vpow2.f32 %v1318_v36  ;;  %v1320_v27 = vmul.f32 1.442695, %v1243_v25  ;;  %v1248_v14 = vsub.f32 %v3251_v48, %v1139_v53  ;;  %1432 = vadd.xlane.f32.xlu1 %v3480_v41 }
 0x244   :  { %v3484_v44 = vpop.eup %2688  ;;  %v1141_v29 = vpop.xlane.xlu1 %1140 }
 0x245   :  { %2702 = vpow2.f32 %v1320_v27  ;;  %v1330_v13 = vmul.f32 1.442695, %v1248_v14  ;;  %v1249_v31 = vsub.f32 %v3255_v50, %v1141_v29  ;;  %1442 = vadd.xlane.f32.xlu0 %v3484_v44 }
 0x246   :  { %v3488_v46 = vpop.eup %2690  ;;  %v1135_v28 = vpop.xlane.xlu0 %1134 }
 0x247   :  { %2704 = vpow2.f32 %v1330_v13  ;;  %v1332_v15 = vmul.f32 1.442695, %v1249_v31  ;;  %v1246_v43 = vsub.f32 %v3259_v52, %v1135_v28  ;;  %1444 = vadd.xlane.f32.xlu1 %v3488_v46 }
 0x248   :  { %v3492_v48 = vpop.eup %2692  ;;  %v1137_v33 = vpop.xlane.xlu1 %1136 }
 0x249   :  { %2706 = vpow2.f32 %v1332_v15  ;;  %v1326_v5 = vmul.f32 1.442695, %v1246_v43  ;;  %v1247_v35 = vsub.f32 %v3263_v54, %v1137_v33  ;;  %1438 = vadd.xlane.f32.xlu0 %v3492_v48 }
 0x24a   :  { %v3496_v50 = vpop.eup %2694  ;;  %v1147_v18 = vpop.xlane.xlu0 %1146 }
 0x24b   :  { %2708 = vpow2.f32 %v1326_v5  ;;  %v1328_v57 = vmul.f32 1.442695, %v1247_v35  ;;  %v1252_v37 = vsub.f32 %v3267_v56, %v1147_v18  ;;  %1440 = vadd.xlane.f32.xlu1 %v3496_v50 }
 0x24c   :  { %v3500_v52 = vpop.eup %2696  ;;  %v1149_v20 = vpop.xlane.xlu1 %1148 }
 0x24d   :  { %2710 = vpow2.f32 %v1328_v57  ;;  %v1338_v21 = vmul.f32 1.442695, %v1252_v37  ;;  %v1253_v23 = vsub.f32 %v3271_v58, %v1149_v20  ;;  %1450 = vadd.xlane.f32.xlu0 %v3500_v52 }
 0x24e   :  { %v3504_v54 = vpop.eup %2698  ;;  %v1143_v36 = vpop.xlane.xlu0 %1142 }
 0x24f   :  { %2712 = vpow2.f32 %v1338_v21  ;;  %v1340_v25 = vmul.f32 1.442695, %v1253_v23  ;;  %v1250_v53 = vsub.f32 %v3275_v60, %v1143_v36  ;;  %1452 = vadd.xlane.f32.xlu1 %v3504_v54 }
 0x250   :  { %v3508_v56 = vpop.eup %2700  ;;  %v1145_v27 = vpop.xlane.xlu1 %1144 }
 0x251   :  { %2714 = vpow2.f32 %v1340_v25  ;;  %v1334_v14 = vmul.f32 1.442695, %v1250_v53  ;;  %v1251_v29 = vsub.f32 %v3279_v62, %v1145_v27  ;;  %1446 = vadd.xlane.f32.xlu0 %v3508_v56 }
 0x252   :  { %v3512_v58 = vpop.eup %2702  ;;  %v1155_v13 = vpop.xlane.xlu0 %1154 }
 0x253   :  { %2716 = vpow2.f32 %v1334_v14  ;;  %v1336_v31 = vmul.f32 1.442695, %v1251_v29  ;;  %v1256_v28 = vsub.f32 %v3283_v0, %v1155_v13  ;;  %1448 = vadd.xlane.f32.xlu1 %v3512_v58 }
 0x254   :  { %v3516_v60 = vpop.eup %2704  ;;  %v1157_v15 = vpop.xlane.xlu1 %1156 }
 0x255   :  { %2718 = vpow2.f32 %v1336_v31  ;;  %v1346_v43 = vmul.f32 1.442695, %v1256_v28  ;;  %v1257_v33 = vsub.f32 %v3287_v2, %v1157_v15  ;;  %1458 = vadd.xlane.f32.xlu0 %v3516_v60 }
 0x256   :  { %v3520_v62 = vpop.eup %2706  ;;  %v1151_v5 = vpop.xlane.xlu0 %1150 }
 0x257   :  { %2720 = vpow2.f32 %v1346_v43  ;;  %v1348_v35 = vmul.f32 1.442695, %v1257_v33  ;;  %v1254_v18 = vsub.f32 %v3291_v4, %v1151_v5  ;;  %1460 = vadd.xlane.f32.xlu1 %v3520_v62 }
 0x258   :  { %v3524_v0 = vpop.eup %2708  ;;  %v1153_v57 = vpop.xlane.xlu1 %1152 }
 0x259   :  { %2722 = vpow2.f32 %v1348_v35  ;;  %v1342_v37 = vmul.f32 1.442695, %v1254_v18  ;;  %v1255_v20 = vsub.f32 %v3295_v6, %v1153_v57  ;;  %1454 = vadd.xlane.f32.xlu0 %v3524_v0 }
 0x25a   :  { %v3528_v2 = vpop.eup %2710  ;;  %v1163_v21 = vpop.xlane.xlu0 %1162 }
 0x25b   :  { %2724 = vpow2.f32 %v1342_v37  ;;  %v1344_v23 = vmul.f32 1.442695, %v1255_v20  ;;  %v1260_v36 = vsub.f32 %v3299_v8, %v1163_v21  ;;  %1456 = vadd.xlane.f32.xlu1 %v3528_v2 }
 0x25c   :  { %v3532_v4 = vpop.eup %2712  ;;  %v1165_v25 = vpop.xlane.xlu1 %1164 }
 0x25d   :  { %2726 = vpow2.f32 %v1344_v23  ;;  %v1354_v53 = vmul.f32 1.442695, %v1260_v36  ;;  %v1261_v27 = vsub.f32 %v3303_v10, %v1165_v25  ;;  %1466 = vadd.xlane.f32.xlu0 %v3532_v4 }
 0x25e   :  { %v3536_v6 = vpop.eup %2714  ;;  %v1159_v14 = vpop.xlane.xlu0 %1158 }
 0x25f   :  { %2728 = vpow2.f32 %v1354_v53  ;;  %v1356_v29 = vmul.f32 1.442695, %v1261_v27  ;;  %v1258_v13 = vsub.f32 %v3307_v12, %v1159_v14  ;;  %1468 = vadd.xlane.f32.xlu1 %v3536_v6 }
 0x260   :  { %v3540_v8 = vpop.eup %2716  ;;  %v1161_v31 = vpop.xlane.xlu1 %1160 }
 0x261   :  { %2730 = vpow2.f32 %v1356_v29  ;;  %v1350_v28 = vmul.f32 1.442695, %v1258_v13  ;;  %v1259_v15 = vsub.f32 %v3311_v16, %v1161_v31  ;;  %1462 = vadd.xlane.f32.xlu0 %v3540_v8 }
 0x262   :  { %v3544_v10 = vpop.eup %2718  ;;  %v1171_v43 = vpop.xlane.xlu0 %1170 }
 0x263   :  { %2732 = vpow2.f32 %v1350_v28  ;;  %v1352_v33 = vmul.f32 1.442695, %v1259_v15  ;;  %v1264_v5 = vsub.f32 %v3315_v19, %v1171_v43  ;;  %1464 = vadd.xlane.f32.xlu1 %v3544_v10 }
 0x264   :  { %v3548_v12 = vpop.eup %2720  ;;  %v1173_v35 = vpop.xlane.xlu1 %1172 }
 0x265   :  { %2734 = vpow2.f32 %v1352_v33  ;;  %v1362_v18 = vmul.f32 1.442695, %v1264_v5  ;;  %v1265_v57 = vsub.f32 %v3319_v22, %v1173_v35  ;;  %1474 = vadd.xlane.f32.xlu0 %v3548_v12 }
 0x266   :  { %v3552_v16 = vpop.eup %2722  ;;  %v1167_v37 = vpop.xlane.xlu0 %1166 }
 0x267   :  { %2736 = vpow2.f32 %v1362_v18  ;;  %v1364_v20 = vmul.f32 1.442695, %v1265_v57  ;;  %v1262_v21 = vsub.f32 %v3323_v26, %v1167_v37  ;;  %1476 = vadd.xlane.f32.xlu1 %v3552_v16 }
 0x268   :  { %v3556_v19 = vpop.eup %2724  ;;  %v1169_v23 = vpop.xlane.xlu1 %1168 }
 0x269   :  { %2738 = vpow2.f32 %v1364_v20  ;;  %v1358_v36 = vmul.f32 1.442695, %v1262_v21  ;;  %v1263_v25 = vsub.f32 %v3327_v30, %v1169_v23  ;;  %1470 = vadd.xlane.f32.xlu0 %v3556_v19 }
 0x26a   :  { %v3560_v22 = vpop.eup %2726  ;;  %v1179_v53 = vpop.xlane.xlu0 %1178 }
 0x26b   :  { %2740 = vpow2.f32 %v1358_v36  ;;  %v1360_v27 = vmul.f32 1.442695, %v1263_v25  ;;  %v1268_v14 = vsub.f32 %v3331_v34, %v1179_v53  ;;  %1472 = vadd.xlane.f32.xlu1 %v3560_v22 }
 0x26c   :  { %v3564_v26 = vpop.eup %2728  ;;  %v1181_v29 = vpop.xlane.xlu1 %1180 }
 0x26d   :  { %2742 = vpow2.f32 %v1360_v27  ;;  %v1370_v13 = vmul.f32 1.442695, %v1268_v14  ;;  %v1269_v31 = vsub.f32 %v3335_v38, %v1181_v29  ;;  %1482 = vadd.xlane.f32.xlu0 %v3564_v26 }
 0x26e   :  { %v3568_v30 = vpop.eup %2730  ;;  %v1175_v28 = vpop.xlane.xlu0 %1174 }
 0x26f   :  { %2744 = vpow2.f32 %v1370_v13  ;;  %v1372_v15 = vmul.f32 1.442695, %v1269_v31  ;;  %v1266_v43 = vsub.f32 %v3339_v42, %v1175_v28  ;;  %1484 = vadd.xlane.f32.xlu1 %v3568_v30 }
 0x270   :  { %v3572_v34 = vpop.eup %2732  ;;  %v1177_v33 = vpop.xlane.xlu1 %1176 }
 0x271   :  { %2746 = vpow2.f32 %v1372_v15  ;;  %v1366_v5 = vmul.f32 1.442695, %v1266_v43  ;;  %v1267_v35 = vsub.f32 %v3343_v47, %v1177_v33  ;;  %1478 = vadd.xlane.f32.xlu0 %v3572_v34 }
 0x272   :  { %v3576_v38 = vpop.eup %2734  ;;  %v1187_v18 = vpop.xlane.xlu0 %1186 }
 0x273   :  { %2748 = vpow2.f32 %v1366_v5  ;;  %v1368_v57 = vmul.f32 1.442695, %v1267_v35  ;;  %v1272_v37 = vsub.f32 %v3347_v51, %v1187_v18  ;;  %1480 = vadd.xlane.f32.xlu1 %v3576_v38 }
 0x274   :  { %v3580_v42 = vpop.eup %2736  ;;  %v1189_v20 = vpop.xlane.xlu1 %1188 }
 0x275   :  { %2750 = vpow2.f32 %v1368_v57  ;;  %v1378_v21 = vmul.f32 1.442695, %v1272_v37  ;;  %v1273_v23 = vsub.f32 %v3351_v55, %v1189_v20  ;;  %1490 = vadd.xlane.f32.xlu0 %v3580_v42 }
 0x276   :  { %v3584_v47 = vpop.eup %2738  ;;  %v1183_v36 = vpop.xlane.xlu0 %1182 }
 0x277   :  { %2752 = vpow2.f32 %v1378_v21  ;;  %v1380_v25 = vmul.f32 1.442695, %v1273_v23  ;;  %v1270_v53 = vsub.f32 %v3355_v59, %v1183_v36  ;;  %1492 = vadd.xlane.f32.xlu1 %v3584_v47 }
 0x278   :  { %v3588_v51 = vpop.eup %2740  ;;  %v1185_v27 = vpop.xlane.xlu1 %1184 }
 0x279   :  { %2754 = vpow2.f32 %v1380_v25  ;;  %v1374_v14 = vmul.f32 1.442695, %v1270_v53  ;;  %v1271_v29 = vsub.f32 %v3359_v63, %v1185_v27  ;;  %1486 = vadd.xlane.f32.xlu0 %v3588_v51 }
 0x27a   :  { %v3592_v55 = vpop.eup %2742  ;;  %v1195_v13 = vpop.xlane.xlu0 %1194 }
 0x27b   :  { %2756 = vpow2.f32 %v1374_v14  ;;  %v1376_v31 = vmul.f32 1.442695, %v1271_v29  ;;  %v1276_v28 = vsub.f32 %v3363_v3, %v1195_v13  ;;  %1488 = vadd.xlane.f32.xlu1 %v3592_v55  ;;  %v3906_v13 = vld [vmem:[#allocation2_spill] sm:$0xff] }
 0x27c   :  { %v3596_v59 = vpop.eup %2744  ;;  %v1197_v15 = vpop.xlane.xlu1 %1196 }
 0x27d   :  { %2758 = vpow2.f32 %v1376_v31  ;;  %v1386_v43 = vmul.f32 1.442695, %v1276_v28  ;;  %v1277_v33 = vsub.f32 %v3367_v7, %v1197_v15  ;;  %1498 = vadd.xlane.f32.xlu0 %v3596_v59 }
 0x27e   :  { %v3600_v63 = vpop.eup %2746  ;;  %v1191_v5 = vpop.xlane.xlu0 %1190 }
 0x27f   :  { %2760 = vpow2.f32 %v1386_v43  ;;  %v1388_v35 = vmul.f32 1.442695, %v1277_v33  ;;  %v1274_v18 = vsub.f32 %v3371_v11, %v1191_v5  ;;  %1500 = vadd.xlane.f32.xlu1 %v3600_v63  ;;  %v3907_v43 = vld [vmem:[#allocation3_spill] sm:$0xff] }
 0x280   :  { %v3604_v3 = vpop.eup %2748  ;;  %v1193_v57 = vpop.xlane.xlu1 %1192 }
 0x281   :  { %2762 = vpow2.f32 %v1388_v35  ;;  %v1382_v37 = vmul.f32 1.442695, %v1274_v18  ;;  %v1275_v20 = vsub.f32 %v3375_v17, %v1193_v57  ;;  %1494 = vadd.xlane.f32.xlu0 %v3604_v3  ;;  %v3908_v18 = vld [vmem:[#allocation4_spill] sm:$0xff] }
 0x282   :  { %v3608_v7 = vpop.eup %2750  ;;  %v1203_v21 = vpop.xlane.xlu0 %1202 }
 0x283   :  { %2764 = vpow2.f32 %v1382_v37  ;;  %v1384_v23 = vmul.f32 1.442695, %v1275_v20  ;;  %v1280_v36 = vsub.f32 %v3379_v24, %v1203_v21  ;;  %1496 = vadd.xlane.f32.xlu1 %v3608_v7 }
 0x284   :  { %v3612_v11 = vpop.eup %2752  ;;  %v1205_v25 = vpop.xlane.xlu1 %1204 }
 0x285   :  { %2766 = vpow2.f32 %v1384_v23  ;;  %v1394_v53 = vmul.f32 1.442695, %v1280_v36  ;;  %v1281_v27 = vsub.f32 %v3383_v32, %v1205_v25  ;;  %1506 = vadd.xlane.f32.xlu0 %v3612_v11  ;;  %v3909_v23 = vld [vmem:[#allocation5_spill] sm:$0xff] }
 0x286   :  { %v3616_v17 = vpop.eup %2754  ;;  %v1199_v14 = vpop.xlane.xlu0 %1198 }
 0x287   :  { %2768 = vpow2.f32 %v1394_v53  ;;  %v1396_v29 = vmul.f32 1.442695, %v1281_v27  ;;  %v1278_v31 = vsub.f32 %v3906_v13, %v1199_v14  ;;  %1508 = vadd.xlane.f32.xlu1 %v3616_v17  ;;  %v3910_v14 = vld [vmem:[#allocation6_spill] sm:$0xff] }
 0x288   :  { %v3620_v24 = vpop.eup %2756  ;;  %v1201_v28 = vpop.xlane.xlu1 %1200 }
 0x289   :  { %2770 = vpow2.f32 %v1396_v29  ;;  %v1390_v15 = vmul.f32 1.442695, %v1278_v31  ;;  %v1279_v33 = vsub.f32 %v3907_v43, %v1201_v28  ;;  %1502 = vadd.xlane.f32.xlu0 %v3620_v24 }
 0x28a   :  { %v3624_v32 = vpop.eup %2758  ;;  %v1211_v5 = vpop.xlane.xlu0 %1210 }
 0x28b   :  { %2772 = vpow2.f32 %v1390_v15  ;;  %v1392_v35 = vmul.f32 1.442695, %v1279_v33  ;;  %v1284_v57 = vsub.f32 %v3908_v18, %v1211_v5  ;;  %1504 = vadd.xlane.f32.xlu1 %v3624_v32  ;;  %v3912_v15 = vld [vmem:[#allocation7_spill] sm:$0xff]  ;;  %v3914_v18 = vld [vmem:[#allocation8_spill] sm:$0xff] }
 0x28c   :  { %v3628_v37 = vpop.eup %2760  ;;  %v1213_v20 = vpop.xlane.xlu1 %1212 }
 0x28d   :  { %2774 = vpow2.f32 %v1392_v35  ;;  %v1402_v21 = vmul.f32 1.442695, %v1284_v57  ;;  %v1285_v36 = vsub.f32 %v3909_v23, %v1213_v20  ;;  %1514 = vadd.xlane.f32.xlu0 %v3628_v37 }
 0x28e   :  { %v3632_v25 = vpop.eup %2762  ;;  %v1207_v53 = vpop.xlane.xlu0 %1206 }
 0x28f   :  { %2776 = vpow2.f32 %v1402_v21  ;;  %v1404_v27 = vmul.f32 1.442695, %v1285_v36  ;;  %v1282_v29 = vsub.f32 %v3910_v14, %v1207_v53  ;;  %1516 = vadd.xlane.f32.xlu1 %v3632_v25  ;;  %v3916_v36 = vld [vmem:[#allocation9_spill] sm:$0xff] }
 0x290   :  { %v3636_v13 = vpop.eup %2764  ;;  %v1209_v31 = vpop.xlane.xlu1 %1208 }
 0x291   :  { %3911 = vst [vmem:[#allocation2_spill] sm:$0xff] %v3636_v13  ;;  %2778 = vpow2.f32 %v1404_v27  ;;  %v1398_v28 = vmul.f32 1.442695, %v1282_v29  ;;  %v1283_v43 = vsub.f32 %v3912_v15, %v1209_v31  ;;  %1510 = vadd.xlane.f32.xlu0 %v3636_v13  ;;  %v3918_v31 = vld [vmem:[#allocation10_spill] sm:$0xff] }
 0x292   :  { %v3640_v33 = vpop.eup %2766  ;;  %v1219_v5 = vpop.xlane.xlu0 %1218 }
 0x293   :  { %3913 = vst [vmem:[#allocation3_spill] sm:$0xff] %v3640_v33  ;;  %2780 = vpow2.f32 %v1398_v28  ;;  %v1400_v35 = vmul.f32 1.442695, %v1283_v43  ;;  %v1288_v57 = vsub.f32 %v3914_v18, %v1219_v5  ;;  %1512 = vadd.xlane.f32.xlu1 %v3640_v33 }
 0x294   :  { %v3644_v20 = vpop.eup %2768  ;;  %v1221_v21 = vpop.xlane.xlu1 %1220 }
 0x295   :  { %3915 = vst [vmem:[#allocation4_spill] sm:$0xff] %v3644_v20  ;;  %2782 = vpow2.f32 %v1400_v35  ;;  %v1410_v23 = vmul.f32 1.442695, %v1288_v57  ;;  %v1289_v53 = vsub.f32 %v3916_v36, %v1221_v21  ;;  %1522 = vadd.xlane.f32.xlu0 %v3644_v20  ;;  %v3920_v35 = vld [vmem:[#allocation11_spill] sm:$0xff] }
 0x296   :  { %v3648_v27 = vpop.eup %2770  ;;  %v1215_v14 = vpop.xlane.xlu0 %1214  ;;  %v3926_v20 = vld [vmem:[#allocation15_spill] sm:$0xff] }
 0x297   :  { %3917 = vst [vmem:[#allocation5_spill] sm:$0xff] %v3648_v27  ;;  %2784 = vpow2.f32 %v1410_v23  ;;  %v1412_v29 = vmul.f32 1.442695, %v1289_v53  ;;  %v1286_v28 = vsub.f32 %v3918_v31, %v1215_v14  ;;  %1524 = vadd.xlane.f32.xlu1 %v3648_v27  ;;  %v3923_v31 = vld [vmem:[#allocation12_spill] sm:$0xff] }
 0x298   :  { %v3652_v15 = vpop.eup %2772  ;;  %v1217_v43 = vpop.xlane.xlu1 %1216 }
 0x299   :  { %3919 = vst [vmem:[#allocation6_spill] sm:$0xff] %v3652_v15  ;;  %2786 = vpow2.f32 %v1412_v29  ;;  %v1406_v5 = vmul.f32 1.442695, %v1286_v28  ;;  %v1287_v18 = vsub.f32 %v3920_v35, %v1217_v43  ;;  %1518 = vadd.xlane.f32.xlu0 %v3652_v15  ;;  %v3924_v43 = vld [vmem:[#allocation14_spill] sm:$0xff] }
 0x29a   :  { %v3656_v57 = vpop.eup %2774  ;;  %v1227_v21 = vpop.xlane.xlu0 %1226 }
 0x29b   :  { %3921 = vst [vmem:[#allocation7_spill] sm:$0xff] %v3656_v57  ;;  %2788 = vpow2.f32 %v1406_v5  ;;  %v1408_v36 = vmul.f32 1.442695, %v1287_v18  ;;  %1520 = vadd.xlane.f32.xlu1 %v3656_v57  ;;  %v1292_v28 = vsub.f32 %v3923_v31, %v1227_v21  ;;  %v3925_v18 = vld [vmem:[#allocation13_spill] sm:$0xff] }
 0x29c   :  { %v3659_v23 = vpop.eup %2776  ;;  %v1229_v53 = vpop.xlane.xlu1 %1228 }
 0x29d   :  { %3922 = vst [vmem:[#allocation8_spill] sm:$0xff] %v3659_v23  ;;  %2790 = vpow2.f32 %v1408_v36  ;;  %1530 = vadd.xlane.f32.xlu0 %v3659_v23  ;;  %v1293_v57 = vsub.f32 %v3925_v18, %v1229_v53  ;;  %v1418_v23 = vmul.f32 1.442695, %v1292_v28 }
 0x29e   :  { %v3662_v14 = vpop.eup %2778  ;;  %v1223_v29 = vpop.xlane.xlu0 %1222 }
 0x29f   :  { %v1290_v35 = vsub.f32 %v3924_v43, %v1223_v29  ;;  %1532 = vadd.xlane.f32.xlu1 %v3662_v14  ;;  %v1420_v29 = vmul.f32 1.442695, %v1293_v57 }
 0x2a0   :  { %v3667_v15 = vpop.eup %2780  ;;  %v1225_v5 = vpop.xlane.xlu1 %1224 }
 0x2a1   :  { %v1414_v27 = vmul.f32 1.442695, %v1290_v35  ;;  %v1291_v33 = vsub.f32 %v3926_v20, %v1225_v5  ;;  %1526 = vadd.xlane.f32.xlu0 %v3667_v15 }
 0x2a2   :  { %v3672_v36 = vpop.eup %2782 }
 0x2a3   :  { %2792 = vpow2.f32 %v1414_v27  ;;  %v1416_v13 = vmul.f32 1.442695, %v1291_v33  ;;  %1528 = vadd.xlane.f32.xlu1 %v3672_v36 }
 0x2a4   :  { %v3675_v21 = vpop.eup %2784 }
 0x2a5   :  { %2794 = vpow2.f32 %v1416_v13  ;;  %1538 = vadd.xlane.f32.xlu0 %v3675_v21 }
 0x2a6   :  { %v3678_v31 = vpop.eup %2786  ;;  %2796 = vpow2.f32 %v1418_v23 }
 0x2a7   :  { %1540 = vadd.xlane.f32.xlu1 %v3678_v31  ;;  %2798 = vpow2.f32 %v1420_v29 }
 0x2a8   :  { %v3681_v20 = vpop.eup %2788 }
 0x2a9   :  { %3927 = vst [vmem:[#allocation9_spill] sm:$0xff] %v3681_v20  ;;  %1534 = vadd.xlane.f32.xlu0 %v3681_v20 }
 0x2aa   :  { %v3684_v27 = vpop.eup %2790 }
 0x2ab   :  { %3928 = vst [vmem:[#allocation10_spill] sm:$0xff] %v3684_v27  ;;  %1536 = vadd.xlane.f32.xlu1 %v3684_v27 }
 0x2b0   :  { %v3687_v33 = vpop.eup %2792 }
 0x2b1   :  { %3929 = vst [vmem:[#allocation11_spill] sm:$0xff] %v3687_v33  ;;  %1542 = vadd.xlane.f32.xlu0 %v3687_v33 }
 0x2b2   :  { %v3690_v13 = vpop.eup %2794 }
 0x2b3   :  { %3930 = vst [vmem:[#allocation12_spill] sm:$0xff] %v3690_v13  ;;  %1544 = vadd.xlane.f32.xlu1 %v3690_v13  ;;  %v3693_v57 = vpop.eup %2796 }
 0x2b4   :  { %3931 = vst [vmem:[#allocation14_spill] sm:$0xff] %v3693_v57  ;;  %v3696_v23 = vpop.eup %2798 }
 0x2b5   :  { %1546 = vadd.xlane.f32.xlu0 %v3693_v57  ;;  %3932 = vst [vmem:[#allocation13_spill] sm:$0xff] %v3696_v23 }
 0x2b7   :  { %1548 = vadd.xlane.f32.xlu1 %v3696_v23 }
 0x2bc   :  { %v1427_v53 = vpop.xlane.xlu0 %1426 }
 0x2bd   :  { %2800 = vrcp.f32 %v1427_v53 }
 0x2c0   :  { %v1429_v28 = vpop.xlane.xlu1 %1428  ;;  %v1423_v43 = vpop.xlane.xlu0 %1422 }
 0x2c1   :  { %2802 = vrcp.f32 %v1429_v28 }
 0x2c2   :  { %2804 = vrcp.f32 %v1423_v43 }
 0x2c4   :  { %v1425_v35 = vpop.xlane.xlu1 %1424 }
 0x2c5   :  { %2806 = vrcp.f32 %v1425_v35 }
 0x2c6   :  { %v1435_v5 = vpop.xlane.xlu0 %1434 }
 0x2c7   :  { %2808 = vrcp.f32 %v1435_v5 }
 0x2c8   :  { %v1437_v18 = vpop.xlane.xlu1 %1436 }
 0x2c9   :  { %2810 = vrcp.f32 %v1437_v18 }
 0x2ca   :  { %v1431_v29 = vpop.xlane.xlu0 %1430  ;;  %v2801_v13 = vpop.eup %2800 }
 0x2cb   :  { %2812 = vrcp.f32 %v1431_v29  ;;  %v1616_v23 = vmul.f32 %v2801_v13, %v3451_v40 }
 0x2cc   :  { %v1433_v57 = vpop.xlane.xlu1 %1432 }
 0x2cd   :  { %2814 = vrcp.f32 %v1433_v57 }
 0x2ce   :  { %v2803_v33 = vpop.eup %2802  ;;  %v1443_v27 = vpop.xlane.xlu0 %1442 }
 0x2cf   :  { %v1617_v53 = vmul.f32 %v2803_v33, %v3458_v45  ;;  %2816 = vrcp.f32 %v1443_v27  ;;  %v2805_v28 = vpop.eup %2804 }
 0x2d0   :  { %v1445_v43 = vpop.xlane.xlu1 %1444  ;;  %v1614_v18 = vmul.f32 %v2805_v28, %v3455_v61 }
 0x2d1   :  { %v2213_v20 = vpack.c.bf16 %v1617_v53, %v1616_v23  ;;  %2818 = vrcp.f32 %v1445_v43 }
 0x2d2   :  { %v2807_v35 = vpop.eup %2806  ;;  %v1439_v5 = vpop.xlane.xlu0 %1438 }
 0x2d3   :  { %2365 = vst [vmem:[%s3864_s5 + $0x8] sm:$0xff] %v2213_v20   ;;  %v1615_v57 = vmul.f32 %v2807_v35, %v3464_v9  ;;  %2820 = vrcp.f32 %v1439_v5 }
 0x2d4   :  { %v2809_v29 = vpop.eup %2808  ;;  %v1441_v40 = vpop.xlane.xlu1 %1440 }
 0x2d5   :  { %v2208_v13 = vpack.c.bf16 %v1615_v57, %v1614_v18  ;;  %2822 = vrcp.f32 %v1441_v40  ;;  %v1620_v33 = vmul.f32 %v2809_v29, %v3468_v1 }
 0x2d6   :  { %v2811_v45 = vpop.eup %2810  ;;  %v1451_v27 = vpop.xlane.xlu0 %1450 }
 0x2d7   :  { %2209 = vst [vmem:[%s3864_s5] sm:$0xff] %v2208_v13   ;;  %v1621_v23 = vmul.f32 %v2811_v45, %v3472_v49  ;;  %2824 = vrcp.f32 %v1451_v27 }
 0x2d8   :  { %v2813_v20 = vpop.eup %2812  ;;  %v1453_v61 = vpop.xlane.xlu1 %1452 }
 0x2d9   :  { %v2223_v53 = vpack.c.bf16 %v1621_v23, %v1620_v33  ;;  %2826 = vrcp.f32 %v1453_v61  ;;  %v1618_v43 = vmul.f32 %v2813_v20, %v3476_v39 }
 0x2da   :  { %v2815_v9 = vpop.eup %2814  ;;  %v1447_v28 = vpop.xlane.xlu0 %1446 }
 0x2db   :  { %2367 = vst [vmem:[%s3864_s5 + $0x18] sm:$0xff] %v2223_v53   ;;  %v1619_v35 = vmul.f32 %v2815_v9, %v3480_v41  ;;  %2828 = vrcp.f32 %v1447_v28 }
 0x2dc   :  { %v2817_v5 = vpop.eup %2816  ;;  %v1449_v1 = vpop.xlane.xlu1 %1448 }
 0x2dd   :  { %v2218_v18 = vpack.c.bf16 %v1619_v35, %v1618_v43  ;;  %2830 = vrcp.f32 %v1449_v1  ;;  %v1624_v29 = vmul.f32 %v2817_v5, %v3484_v44 }
 0x2de   :  { %v2819_v49 = vpop.eup %2818  ;;  %v1459_v57 = vpop.xlane.xlu0 %1458 }
 0x2df   :  { %2366 = vst [vmem:[%s3864_s5 + $0x10] sm:$0xff] %v2218_v18   ;;  %v1625_v40 = vmul.f32 %v2819_v49, %v3488_v46  ;;  %2832 = vrcp.f32 %v1459_v57 }
 0x2e0   :  { %v2821_v13 = vpop.eup %2820  ;;  %v1461_v39 = vpop.xlane.xlu1 %1460 }
 0x2e1   :  { %v2233_v45 = vpack.c.bf16 %v1625_v40, %v1624_v29  ;;  %2834 = vrcp.f32 %v1461_v39  ;;  %v1622_v33 = vmul.f32 %v2821_v13, %v3492_v48 }
 0x2e2   :  { %v2823_v41 = vpop.eup %2822  ;;  %v1455_v27 = vpop.xlane.xlu0 %1454 }
 0x2e3   :  { %2369 = vst [vmem:[%s3864_s5 + $0x28] sm:$0xff] %v2233_v45   ;;  %v1623_v23 = vmul.f32 %v2823_v41, %v3496_v50  ;;  %2836 = vrcp.f32 %v1455_v27 }
 0x2e4   :  { %v2825_v20 = vpop.eup %2824  ;;  %v1457_v44 = vpop.xlane.xlu1 %1456 }
 0x2e5   :  { %v2228_v61 = vpack.c.bf16 %v1623_v23, %v1622_v33  ;;  %2838 = vrcp.f32 %v1457_v44  ;;  %v1628_v9 = vmul.f32 %v2825_v20, %v3500_v52 }
 0x2e6   :  { %v2827_v46 = vpop.eup %2826  ;;  %v1467_v53 = vpop.xlane.xlu0 %1466 }
 0x2e7   :  { %2368 = vst [vmem:[%s3864_s5 + $0x20] sm:$0xff] %v2228_v61   ;;  %v1629_v28 = vmul.f32 %v2827_v46, %v3504_v54  ;;  %2840 = vrcp.f32 %v1467_v53 }
 0x2e8   :  { %v2829_v43 = vpop.eup %2828  ;;  %v1469_v48 = vpop.xlane.xlu1 %1468 }
 0x2e9   :  { %v2243_v35 = vpack.c.bf16 %v1629_v28, %v1628_v9  ;;  %2842 = vrcp.f32 %v1469_v48  ;;  %v1626_v1 = vmul.f32 %v2829_v43, %v3508_v56 }
 0x2ea   :  { %v2831_v50 = vpop.eup %2830  ;;  %v1463_v5 = vpop.xlane.xlu0 %1462 }
 0x2eb   :  { %2371 = vst [vmem:[%s3864_s5 + $0x38] sm:$0xff] %v2243_v35   ;;  %v1627_v18 = vmul.f32 %v2831_v50, %v3512_v58  ;;  %2844 = vrcp.f32 %v1463_v5 }
 0x2ec   :  { %v2833_v49 = vpop.eup %2832  ;;  %v1465_v52 = vpop.xlane.xlu1 %1464 }
 0x2ed   :  { %v2238_v57 = vpack.c.bf16 %v1627_v18, %v1626_v1  ;;  %2846 = vrcp.f32 %v1465_v52  ;;  %v1632_v40 = vmul.f32 %v2833_v49, %v3516_v60 }
 0x2ee   :  { %v2835_v54 = vpop.eup %2834  ;;  %v1475_v29 = vpop.xlane.xlu0 %1474 }
 0x2ef   :  { %2370 = vst [vmem:[%s3864_s5 + $0x30] sm:$0xff] %v2238_v57   ;;  %v1633_v13 = vmul.f32 %v2835_v54, %v3520_v62  ;;  %2848 = vrcp.f32 %v1475_v29 }
 0x2f0   :  { %v2837_v39 = vpop.eup %2836  ;;  %v1477_v56 = vpop.xlane.xlu1 %1476 }
 0x2f1   :  { %v2253_v45 = vpack.c.bf16 %v1633_v13, %v1632_v40  ;;  %2850 = vrcp.f32 %v1477_v56  ;;  %v1630_v27 = vmul.f32 %v2837_v39, %v3524_v0 }
 0x2f2   :  { %v2839_v58 = vpop.eup %2838  ;;  %v1471_v41 = vpop.xlane.xlu0 %1470 }
 0x2f3   :  { %2373 = vst [vmem:[%s3864_s5 + $0x48] sm:$0xff] %v2253_v45   ;;  %v1631_v33 = vmul.f32 %v2839_v58, %v3528_v2  ;;  %2852 = vrcp.f32 %v1471_v41 }
 0x2f4   :  { %v2841_v23 = vpop.eup %2840  ;;  %v1473_v60 = vpop.xlane.xlu1 %1472 }
 0x2f5   :  { %v2248_v20 = vpack.c.bf16 %v1631_v33, %v1630_v27  ;;  %2854 = vrcp.f32 %v1473_v60  ;;  %v1636_v61 = vmul.f32 %v2841_v23, %v3532_v4 }
 0x2f6   :  { %v2843_v62 = vpop.eup %2842  ;;  %v1483_v44 = vpop.xlane.xlu0 %1482 }
 0x2f7   :  { %2372 = vst [vmem:[%s3864_s5 + $0x40] sm:$0xff] %v2248_v20   ;;  %v1637_v46 = vmul.f32 %v2843_v62, %v3536_v6  ;;  %2856 = vrcp.f32 %v1483_v44 }
 0x2f8   :  { %v2845_v53 = vpop.eup %2844  ;;  %v1485_v0 = vpop.xlane.xlu1 %1484 }
 0x2f9   :  { %v2263_v9 = vpack.c.bf16 %v1637_v46, %v1636_v61  ;;  %2858 = vrcp.f32 %v1485_v0  ;;  %v1634_v43 = vmul.f32 %v2845_v53, %v3540_v8 }
 0x2fa   :  { %v2847_v2 = vpop.eup %2846  ;;  %v1479_v28 = vpop.xlane.xlu0 %1478 }
 0x2fb   :  { %2375 = vst [vmem:[%s3864_s5 + $0x58] sm:$0xff] %v2263_v9   ;;  %v1635_v48 = vmul.f32 %v2847_v2, %v3544_v10  ;;  %2860 = vrcp.f32 %v1479_v28 }
 0x2fc   :  { %v2849_v35 = vpop.eup %2848  ;;  %v1481_v4 = vpop.xlane.xlu1 %1480 }
 0x2fd   :  { %v2258_v50 = vpack.c.bf16 %v1635_v48, %v1634_v43  ;;  %2862 = vrcp.f32 %v1481_v4  ;;  %v1640_v1 = vmul.f32 %v2849_v35, %v3548_v12 }
 0x2fe   :  { %v2851_v6 = vpop.eup %2850  ;;  %v1491_v5 = vpop.xlane.xlu0 %1490 }
 0x2ff   :  { %2374 = vst [vmem:[%s3864_s5 + $0x50] sm:$0xff] %v2258_v50   ;;  %v1641_v18 = vmul.f32 %v2851_v6, %v3552_v16  ;;  %2864 = vrcp.f32 %v1491_v5 }
 0x300   :  { %v2853_v49 = vpop.eup %2852  ;;  %v1493_v8 = vpop.xlane.xlu1 %1492 }
 0x301   :  { %v2273_v52 = vpack.c.bf16 %v1641_v18, %v1640_v1  ;;  %2866 = vrcp.f32 %v1493_v8  ;;  %v1638_v54 = vmul.f32 %v2853_v49, %v3556_v19 }
 0x302   :  { %v2855_v10 = vpop.eup %2854  ;;  %v1487_v57 = vpop.xlane.xlu0 %1486 }
 0x303   :  { %2377 = vst [vmem:[%s3864_s5 + $0x68] sm:$0xff] %v2273_v52   ;;  %v1639_v29 = vmul.f32 %v2855_v10, %v3560_v22  ;;  %2868 = vrcp.f32 %v1487_v57 }
 0x304   :  { %v2857_v40 = vpop.eup %2856  ;;  %v1489_v12 = vpop.xlane.xlu1 %1488 }
 0x305   :  { %v2268_v13 = vpack.c.bf16 %v1639_v29, %v1638_v54  ;;  %2870 = vrcp.f32 %v1489_v12  ;;  %v1644_v56 = vmul.f32 %v2857_v40, %v3564_v26 }
 0x306   :  { %v2859_v16 = vpop.eup %2858  ;;  %v1499_v39 = vpop.xlane.xlu0 %1498 }
 0x307   :  { %2376 = vst [vmem:[%s3864_s5 + $0x60] sm:$0xff] %v2268_v13   ;;  %v1645_v45 = vmul.f32 %v2859_v16, %v3568_v30  ;;  %2872 = vrcp.f32 %v1499_v39 }
 0x308   :  { %v2861_v58 = vpop.eup %2860  ;;  %v1501_v19 = vpop.xlane.xlu1 %1500 }
 0x309   :  { %v2283_v41 = vpack.c.bf16 %v1645_v45, %v1644_v56  ;;  %2874 = vrcp.f32 %v1501_v19  ;;  %v1642_v33 = vmul.f32 %v2861_v58, %v3572_v34 }
 0x30a   :  { %v2863_v22 = vpop.eup %2862  ;;  %v1495_v27 = vpop.xlane.xlu0 %1494 }
 0x30b   :  { %2379 = vst [vmem:[%s3864_s5 + $0x78] sm:$0xff] %v2283_v41   ;;  %v1643_v23 = vmul.f32 %v2863_v22, %v3576_v38  ;;  %2876 = vrcp.f32 %v1495_v27  ;;  %v3933_v27 = vld [vmem:[#allocation2_spill] sm:$0xff] }
 0x30c   :  { %v2865_v60 = vpop.eup %2864  ;;  %v1497_v26 = vpop.xlane.xlu1 %1496 }
 0x30d   :  { %v2278_v20 = vpack.c.bf16 %v1643_v23, %v1642_v33  ;;  %2878 = vrcp.f32 %v1497_v26  ;;  %v1648_v44 = vmul.f32 %v2865_v60, %v3580_v42  ;;  %v3934_v23 = vld [vmem:[#allocation3_spill] sm:$0xff] }
 0x30e   :  { %v2867_v30 = vpop.eup %2866  ;;  %v1507_v62 = vpop.xlane.xlu0 %1506 }
 0x30f   :  { %2378 = vst [vmem:[%s3864_s5 + $0x70] sm:$0xff] %v2278_v20   ;;  %v1649_v61 = vmul.f32 %v2867_v30, %v3584_v47  ;;  %2880 = vrcp.f32 %v1507_v62  ;;  %v3935_v62 = vld [vmem:[#allocation4_spill] sm:$0xff] }
 0x310   :  { %v2869_v46 = vpop.eup %2868  ;;  %v1509_v34 = vpop.xlane.xlu1 %1508 }
 0x311   :  { %v2293_v53 = vpack.c.bf16 %v1649_v61, %v1648_v44  ;;  %2882 = vrcp.f32 %v1509_v34  ;;  %v1646_v9 = vmul.f32 %v2869_v46, %v3588_v51  ;;  %v3936_v61 = vld [vmem:[#allocation5_spill] sm:$0xff] }
 0x312   :  { %v2871_v38 = vpop.eup %2870  ;;  %v1503_v0 = vpop.xlane.xlu0 %1502 }
 0x313   :  { %2381 = vst [vmem:[%s3864_s5 + $0x88] sm:$0xff] %v2293_v53   ;;  %v1647_v2 = vmul.f32 %v2871_v38, %v3592_v55  ;;  %2884 = vrcp.f32 %v1503_v0 }
 0x314   :  { %v2873_v28 = vpop.eup %2872  ;;  %v1505_v42 = vpop.xlane.xlu1 %1504 }
 0x315   :  { %v2288_v43 = vpack.c.bf16 %v1647_v2, %v1646_v9  ;;  %2886 = vrcp.f32 %v1505_v42  ;;  %v1652_v35 = vmul.f32 %v2873_v28, %v3596_v59  ;;  %v3937_v2 = vld [vmem:[#allocation6_spill] sm:$0xff]  ;;  %v3938_v42 = vld [vmem:[#allocation7_spill] sm:$0xff] }
 0x316   :  { %v2875_v47 = vpop.eup %2874  ;;  %v1515_v48 = vpop.xlane.xlu0 %1514 }
 0x317   :  { %2380 = vst [vmem:[%s3864_s5 + $0x80] sm:$0xff] %v2288_v43   ;;  %v1653_v4 = vmul.f32 %v2875_v47, %v3600_v63  ;;  %2888 = vrcp.f32 %v1515_v48 }
 0x318   :  { %v2877_v50 = vpop.eup %2876  ;;  %v1517_v51 = vpop.xlane.xlu1 %1516 }
 0x319   :  { %v2303_v6 = vpack.c.bf16 %v1653_v4, %v1652_v35  ;;  %2890 = vrcp.f32 %v1517_v51  ;;  %v1650_v1 = vmul.f32 %v2877_v50, %v3604_v3  ;;  %v3939_v50 = vld [vmem:[#allocation8_spill] sm:$0xff] }
 0x31a   :  { %v2879_v55 = vpop.eup %2878  ;;  %v1511_v5 = vpop.xlane.xlu0 %1510 }
 0x31b   :  { %2383 = vst [vmem:[%s3864_s5 + $0x98] sm:$0xff] %v2303_v6   ;;  %v1651_v18 = vmul.f32 %v2879_v55, %v3608_v7  ;;  %2892 = vrcp.f32 %v1511_v5 }
 0x31c   :  { %v2881_v49 = vpop.eup %2880  ;;  %v1513_v59 = vpop.xlane.xlu1 %1512 }
 0x31d   :  { %v2298_v8 = vpack.c.bf16 %v1651_v18, %v1650_v1  ;;  %2894 = vrcp.f32 %v1513_v59  ;;  %v1656_v10 = vmul.f32 %v2881_v49, %v3612_v11 }
 0x31e   :  { %v2883_v63 = vpop.eup %2882  ;;  %v1523_v52 = vpop.xlane.xlu0 %1522 }
 0x31f   :  { %2382 = vst [vmem:[%s3864_s5 + $0x90] sm:$0xff] %v2298_v8   ;;  %v1657_v57 = vmul.f32 %v2883_v63, %v3616_v17  ;;  %2896 = vrcp.f32 %v1523_v52 }
 0x320   :  { %v2885_v54 = vpop.eup %2884  ;;  %v1525_v3 = vpop.xlane.xlu1 %1524 }
 0x321   :  { %v2313_v29 = vpack.c.bf16 %v1657_v57, %v1656_v10  ;;  %2898 = vrcp.f32 %v1525_v3  ;;  %v1654_v12 = vmul.f32 %v2885_v54, %v3620_v24 }
 0x322   :  { %v2887_v7 = vpop.eup %2886  ;;  %v1519_v40 = vpop.xlane.xlu0 %1518 }
 0x323   :  { %2385 = vst [vmem:[%s3864_s5 + $0xa8] sm:$0xff] %v2313_v29   ;;  %v1655_v13 = vmul.f32 %v2887_v7, %v3624_v32  ;;  %2900 = vrcp.f32 %v1519_v40  ;;  %v3940_v7 = vld [vmem:[#allocation9_spill] sm:$0xff] }
 0x324   :  { %v2889_v16 = vpop.eup %2888  ;;  %v1521_v11 = vpop.xlane.xlu1 %1520 }
 0x325   :  { %v2308_v39 = vpack.c.bf16 %v1655_v13, %v1654_v12  ;;  %2902 = vrcp.f32 %v1521_v11  ;;  %v1660_v45 = vmul.f32 %v2889_v16, %v3628_v37  ;;  %v3941_v12 = vld [vmem:[#allocation10_spill] sm:$0xff]  ;;  %v3942_v11 = vld [vmem:[#allocation11_spill] sm:$0xff] }
 0x326   :  { %v2891_v17 = vpop.eup %2890  ;;  %v1531_v56 = vpop.xlane.xlu0 %1530 }
 0x327   :  { %2384 = vst [vmem:[%s3864_s5 + $0xa0] sm:$0xff] %v2308_v39   ;;  %v1661_v58 = vmul.f32 %v2891_v17, %v3632_v25  ;;  %2904 = vrcp.f32 %v1531_v56  ;;  %v3943_v17 = vld [vmem:[#allocation12_spill] sm:$0xff] }
 0x328   :  { %v2893_v19 = vpop.eup %2892  ;;  %v1533_v24 = vpop.xlane.xlu1 %1532 }
 0x329   :  { %v2323_v41 = vpack.c.bf16 %v1661_v58, %v1660_v45  ;;  %2906 = vrcp.f32 %v1533_v24  ;;  %v1658_v33 = vmul.f32 %v2893_v19, %v3933_v27  ;;  %v3944_v24 = vld [vmem:[#allocation14_spill] sm:$0xff] }
 0x32a   :  { %v2895_v32 = vpop.eup %2894  ;;  %v1527_v22 = vpop.xlane.xlu0 %1526 }
 0x32b   :  { %2387 = vst [vmem:[%s3864_s5 + $0xb8] sm:$0xff] %v2323_v41   ;;  %v1659_v60 = vmul.f32 %v2895_v32, %v3934_v23  ;;  %2908 = vrcp.f32 %v1527_v22  ;;  %v3945_v32 = vld [vmem:[#allocation13_spill] sm:$0xff] }
 0x32c   :  { %v2897_v26 = vpop.eup %2896  ;;  %v1529_v37 = vpop.xlane.xlu1 %1528 }
 0x32d   :  { %v2318_v20 = vpack.c.bf16 %v1659_v60, %v1658_v33  ;;  %2910 = vrcp.f32 %v1529_v37  ;;  %v1664_v44 = vmul.f32 %v2897_v26, %v3935_v62 }
 0x32e   :  { %v2899_v25 = vpop.eup %2898  ;;  %v1539_v30 = vpop.xlane.xlu0 %1538 }
 0x32f   :  { %2386 = vst [vmem:[%s3864_s5 + $0xb0] sm:$0xff] %v2318_v20   ;;  %v1665_v46 = vmul.f32 %v2899_v25, %v3936_v61  ;;  %2912 = vrcp.f32 %v1539_v30 }
 0x330   :  { %v2901_v34 = vpop.eup %2900  ;;  %v1541_v53 = vpop.xlane.xlu1 %1540 }
 0x331   :  { %v2333_v38 = vpack.c.bf16 %v1665_v46, %v1664_v44  ;;  %2914 = vrcp.f32 %v1541_v53  ;;  %v1662_v28 = vmul.f32 %v2901_v34, %v3937_v2 }
 0x332   :  { %v2903_v0 = vpop.eup %2902  ;;  %v1535_v9 = vpop.xlane.xlu0 %1534 }
 0x333   :  { %2389 = vst [vmem:[%s3864_s5 + $0xc8] sm:$0xff] %v2333_v38   ;;  %v1663_v43 = vmul.f32 %v2903_v0, %v3938_v42  ;;  %2916 = vrcp.f32 %v1535_v9 }
 0x334   :  { %v2905_v47 = vpop.eup %2904  ;;  %v1537_v48 = vpop.xlane.xlu1 %1536 }
 0x335   :  { %v2328_v35 = vpack.c.bf16 %v1663_v43, %v1662_v28  ;;  %2918 = vrcp.f32 %v1537_v48  ;;  %v1668_v51 = vmul.f32 %v2905_v47, %v3939_v50 }
 0x336   :  { %v2907_v4 = vpop.eup %2906 }
 0x337   :  { %2388 = vst [vmem:[%s3864_s5 + $0xc0] sm:$0xff] %v2328_v35   ;;  %v1669_v6 = vmul.f32 %v2907_v4, %v3662_v14 }
 0x338   :  { %v2909_v55 = vpop.eup %2908 }
 0x339   :  { %v2343_v5 = vpack.c.bf16 %v1669_v6, %v1668_v51  ;;  %v1666_v49 = vmul.f32 %v2909_v55, %v3667_v15 }
 0x33a   :  { %v2911_v1 = vpop.eup %2910  ;;  %v1543_v18 = vpop.xlane.xlu0 %1542 }
 0x33b   :  { %2391 = vst [vmem:[%s3864_s5 + $0xd8] sm:$0xff] %v2343_v5   ;;  %v1667_v59 = vmul.f32 %v2911_v1, %v3672_v36  ;;  %2920 = vrcp.f32 %v1543_v18 }
 0x33c   :  { %v2913_v8 = vpop.eup %2912  ;;  %v1545_v63 = vpop.xlane.xlu1 %1544 }
 0x33d   :  { %v2338_v52 = vpack.c.bf16 %v1667_v59, %v1666_v49  ;;  %2922 = vrcp.f32 %v1545_v63  ;;  %v1672_v14 = vmul.f32 %v2913_v8, %v3675_v21 }
 0x33e   :  { %v2915_v10 = vpop.eup %2914  ;;  %v1547_v57 = vpop.xlane.xlu0 %1546 }
 0x33f   :  { %2390 = vst [vmem:[%s3864_s5 + $0xd0] sm:$0xff] %v2338_v52   ;;  %v1673_v54 = vmul.f32 %v2915_v10, %v3678_v31  ;;  %2924 = vrcp.f32 %v1547_v57 }
 0x340   :  { %v2917_v3 = vpop.eup %2916  ;;  %v1549_v15 = vpop.xlane.xlu1 %1548 }
 0x341   :  { %v2353_v29 = vpack.c.bf16 %v1673_v54, %v1672_v14  ;;  %2926 = vrcp.f32 %v1549_v15  ;;  %v1670_v40 = vmul.f32 %v2917_v3, %v3940_v7 }
 0x342   :  { %v2919_v36 = vpop.eup %2918 }
 0x343   :  { %2393 = vst [vmem:[%s3864_s5 + $0xe8] sm:$0xff] %v2353_v29   ;;  %v1671_v13 = vmul.f32 %v2919_v36, %v3941_v12 }
 0x345   :  { %v2348_v16 = vpack.c.bf16 %v1671_v13, %v1670_v40 }
 0x347   :  { %2392 = vst [vmem:[%s3864_s5 + $0xe0] sm:$0xff] %v2348_v16  }
 0x348   :  { %v2921_v21 = vpop.eup %2920 }
 0x349   :  { %v1674_v39 = vmul.f32 %v2921_v21, %v3942_v11 }
 0x34a   :  { %v2923_v31 = vpop.eup %2922 }
 0x34b   :  { %v1675_v56 = vmul.f32 %v2923_v31, %v3943_v17 }
 0x34c   :  { %v2925_v45 = vpop.eup %2924 }
 0x34d   :  { %v2358_v58 = vpack.c.bf16 %v1675_v56, %v1674_v39  ;;  %v1676_v41 = vmul.f32 %v2925_v45, %v3944_v24 }
 0x34e   :  { %v2927_v19 = vpop.eup %2926 }
 0x34f   :  { %2394 = vst [vmem:[%s3864_s5 + $0xf0] sm:$0xff] %v2358_v58   ;;  %v1677_v22 = vmul.f32 %v2927_v19, %v3945_v32 }
 0x351   :  { %v2363_v27 = vpack.c.bf16 %v1677_v22, %v1676_v41 }
 0x353   :  { %2395 = vst [vmem:[%s3864_s5 + $0xf8] sm:$0xff] %v2363_v27  }

</bundles_post_ra>
